<compile_context>
chip_gen: v5e
topology: v5e:2x2
jax: 0.10.0
libtpu: 0.0.40
codegen_flags: <defaults>
</compile_context>

<pallas_src>
import functools

import numpy as np
import jax
import jax.numpy as jnp
from jax import lax
from jax.experimental import pallas as pl
from jax.experimental.pallas import tpu as pltpu


# ---------------------------------------------------------------------------
# Deterministic PQMF analysis filter-bank construction (NumPy, trace time).
# ---------------------------------------------------------------------------
def _kaiser_beta(attenuation):
    if attenuation > 50:
        return 0.1102 * (attenuation - 8.7)
    if attenuation >= 21:
        return 0.5842 * (attenuation - 21) ** 0.4 + 0.07886 * (attenuation - 21)
    return 0.0


def _pqmf_analysis_bank(attenuation, n_band):
    """Cosine-modulated analysis bank, returned as [taps, n_band] (f32)."""
    M = n_band
    L = 8 * M + 1                                    # odd-length symmetric prototype
    beta = _kaiser_beta(attenuation)
    n = np.arange(L) - (L - 1) / 2.0
    wc = np.pi / (2.0 * M)                           # prototype cutoff
    h_proto = (wc / np.pi) * np.sinc(wc * n / np.pi) * np.kaiser(L, beta)
    k = np.arange(M)[:, None]
    phase = (2 * k + 1) * (np.pi / (2.0 * M)) * n[None, :] + ((-1.0) ** k) * np.pi / 4.0
    h_k = 2.0 * h_proto[None, :] * np.cos(phase)     # [M, L]
    return np.ascontiguousarray(h_k.T).astype(np.float32)  # [L, M]


@functools.lru_cache(maxsize=None)
def _padded_bank(attenuation, n_band):
    """Bank lane-padded to 128 columns, built once in NumPy (trace time)."""
    bank = _pqmf_analysis_bank(attenuation, n_band)          # [8M+1, M]
    taps = bank.shape[0]
    w = np.zeros((taps, 128), np.float32)
    w[:, :n_band] = bank
    return w


def _round_up(x, m):
    return ((x + m - 1) // m) * m


# ---------------------------------------------------------------------------
# Pallas kernel: per (channel, frame-tile) grid point, build F PQMF frames
# from the polyphase blocks with ONE fused K=8M bf16 matmul + a rank-1 tap,
# square, reduce over frames, and accumulate into a resident (8, 128) block.
# ---------------------------------------------------------------------------
def _make_pqmf_sq_kernel(F, M, n_frames):
    def kernel(dmain_ref, dtail_ref, w_ref, out_ref):
        i = pl.program_id(1)
        n_tiles = pl.num_programs(1)

        @pl.when(i == 0)
        def _init():
            out_ref[...] = jnp.zeros_like(out_ref)

        # (F + 16, M) bf16 window of hop-sized polyphase blocks for this tile.
        win = jnp.concatenate([dmain_ref[...], dtail_ref[...]], axis=0)

        # Hankel LHS: lhs[f, j*M + r] = win[f + j, r]  -> single K = 8*M dot.
        lhs = jnp.concatenate(
            [lax.slice_in_dim(win, j, j + F, axis=0) for j in range(8)], axis=1)
        pq = jnp.dot(lhs, w_ref[0:8 * M, :],
                     preferred_element_type=jnp.float32)            # (F, 128) f32

        # Final (8M+1)-th tap: rank-1 update on the VPU.
        tail = lax.slice_in_dim(win, 8, 8 + F, axis=0)[:, 0:1].astype(jnp.float32)
        pq = pq + tail * w_ref[pl.ds(8 * M, 1), :].astype(jnp.float32)

        sq = pq * pq

        def _accumulate(v):
            # (F,128) -> (F//8, 8, 128) is layout-free; sum axis 0 = vreg adds.
            out_ref[...] += jnp.sum(v.reshape(F // 8, 8, 128), axis=0)

        if n_frames % F != 0:
            @pl.when(i < n_tiles - 1)
            def _full_tiles():
                _accumulate(sq)

            @pl.when(i == n_tiles - 1)
            def _last_tile():
                # Mask frames that only exist because n_frames was padded to F.
                rows = i * F + lax.broadcasted_iota(jnp.int32, (F, 1), 0)
                _accumulate(jnp.where(rows < n_frames, sq, 0.0))
        else:
            _accumulate(sq)

    return kernel


def _pqmf_scale_sq_sum(d_bf16, w_np, n_band, *, tile_frames=256):
    """sum over channels/frames/bands of PQMF(d)**2, and the element count."""
    BC, T = d_bf16.shape
    M = n_band
    taps = w_np.shape[0]                    # 8*M + 1
    pad_l = taps // 2                       # 4*M
    n_frames = (T + 2 * pad_l - taps) // M + 1          # == ceil(T / M)

    F = min(tile_frames, _round_up(n_frames, 16))       # F % 16 == 0
    n_frames_p = _round_up(n_frames, F)
    n_blocks = n_frames_p + 16                           # +16 blocks of overlap
    pad_r = n_blocks * M - pad_l - T

    dp = jnp.pad(d_bf16, ((0, 0), (pad_l, pad_r)))       # pad in bf16
    blocks = dp.reshape(BC, n_blocks, M)                  # bf16 HBM storage
    w = jnp.asarray(w_np).astype(jnp.bfloat16)            # (taps, 128) bf16 bank

    n_tiles = n_frames_p // F
    out = pl.pallas_call(
        _make_pqmf_sq_kernel(F, M, n_frames),
        out_shape=jax.ShapeDtypeStruct((BC, 8, 128), jnp.float32),
        grid_spec=pltpu.PrefetchScalarGridSpec(
            num_scalar_prefetch=0,
            grid=(BC, n_tiles),
            in_specs=[
                # Main window of this tile: F polyphase blocks.
                pl.BlockSpec((None, F, M), lambda b, i: (b, i, 0)),
                # 16-block overlap tail starting at element (i+1)*F (F%16==0).
                pl.BlockSpec((None, 16, M),
                             lambda b, i: (b, (i + 1) * (F // 16), 0)),
                # Filter bank, resident for the whole grid.
                pl.BlockSpec((taps, 128), lambda b, i: (0, 0)),
            ],
            # Per-channel accumulator, resident across the frame-tile axis.
            out_specs=pl.BlockSpec((None, 8, 128), lambda b, i: (b, 0, 0)),
        ),
        compiler_params=pltpu.CompilerParams(
            dimension_semantics=("parallel", "arbitrary")),
    )(blocks, blocks, w)

    # Final tiny reduction of (BC, 8, 128) deferred to the wrapper.
    return jnp.sum(out), BC * M * n_frames


def multiscale_pqmf_loss(x, y, n_channels=2, attenuation=70, band_counts=(8, 16, 32)):
    """Equivalent of MultiScalePQMFLoss.forward: sum over scales of
    mean((PQMF(input) - PQMF(target))**2)."""
    # TODO(synk): the original module calls .cpu() before PQMF; that host
    # transfer has no TPU-kernel meaning and is intentionally dropped.
    x = x.astype(jnp.float32)
    y = y.astype(jnp.float32)
    B, C, T = x.shape
    # PQMF is linear -> PQMF(x) - PQMF(y) == PQMF(x - y): one stream.
    # Cast the difference signal to bf16 once for all scales (bf16 MXU path,
    # f32 accumulation in the kernel).
    d = (x - y).reshape(B * C, T).astype(jnp.bfloat16)
    # TODO(synk): for v7x megacore with B*C == 1, also split the frame axis
    # into a parallel grid dim; with B*C >= 2 the channel axis already shards.
    loss = jnp.float32(0.0)
    for M in band_counts:
        w_np = _padded_bank(attenuation, M)
        s, cnt = _pqmf_scale_sq_sum(d, w_np, M)
        loss = loss + s / jnp.float32(cnt)
    return loss


# ---------------------------------------------------------------------------
# Plain-JAX f32 reference (im2col framing, input/target filtered separately
# exactly like the torch module) — used only for the self-check.
# ---------------------------------------------------------------------------
def _frame_ref(x, taps, hop):
    B, C, T = x.shape
    pad = taps // 2
    xp = jnp.pad(x.reshape(B * C, T), ((0, 0), (pad, pad)))
    n_frames = (T + 2 * pad - taps) // hop + 1
    idx = jnp.arange(n_frames)[:, None] * hop + jnp.arange(taps)[None, :]
    return xp[:, idx].reshape(B * C * n_frames, taps)


if __name__ == "__main__":
    key = jax.random.PRNGKey(0)
    k1, k2 = jax.random.split(key)
    B, C, T = 2, 2, 8000            # batch=2, n_channels=2, short audio clip
    inp = jax.random.normal(k1, (B, C, T), dtype=jnp.float32)
    tgt = jax.random.normal(k2, (B, C, T), dtype=jnp.float32)

    loss = jax.block_until_ready(multiscale_pqmf_loss(inp, tgt))

    # f32 reference.
    ref = jnp.float32(0.0)
    for M in (8, 16, 32):
        bank = jnp.asarray(_pqmf_analysis_bank(70, M))
        fx = _frame_ref(inp, bank.shape[0], M)
        fy = _frame_ref(tgt, bank.shape[0], M)
        dx = jnp.dot(fx, bank, precision=lax.Precision.HIGHEST)
        dy = jnp.dot(fy, bank, precision=lax.Precision.HIGHEST)
        ref = ref + jnp.mean((dx - dy) ** 2)

    got, ref = float(loss), float(ref)
    # Tolerance accounts for bf16 storage of the difference signal AND the
    # bf16 filter bank (bf16 MXU path); per-element rounding ~0.3%, giving
    # at most ~1% bias on the mean of squares.
    assert abs(got - ref) <= 2e-2 * max(1.0, abs(ref)), (got, ref)
    print("KERNEL_OK")
</pallas_src>

<mosaic_0001>
module attributes {stable_mosaic.version = 11 : i64} {
  func.func @kernel(%arg0: i32, %arg1: i32, %arg2: memref<1x256x8xbf16, #tpu.memory_space<vmem>>, %arg3: memref<1x16x8xbf16, #tpu.memory_space<vmem>>, %arg4: memref<65x128xbf16, #tpu.memory_space<vmem>>, %arg5: memref<1x8x128xf32, #tpu.memory_space<vmem>>) attributes {dimension_semantics = [#tpu.dimension_semantics<parallel>, #tpu.dimension_semantics<arbitrary>], iteration_bounds = array<i64: 4, 4>, scalar_prefetch = 0 : i64, scratch_operands = 0 : i64, tpu.core_type = #tpu.core_type<tc>, window_params = [{transform_indices = @transform_0, window_bounds = array<i64: 1, 256, 8>}, {transform_indices = @transform_1, window_bounds = array<i64: 1, 16, 8>}, {pipeline_mode = #tpu.pipeline_mode<synchronous>, transform_indices = @transform_2, window_bounds = array<i64: 65, 128>}, {transform_indices = @transform_3, window_bounds = array<i64: 1, 8, 128>}]} {
    %c0_i32 = arith.constant 0 : i32
    %0 = arith.cmpi eq, %arg1, %c0_i32 : i32
    %1 = arith.extui %0 : i1 to i32
    %c0_i32_0 = arith.constant 0 : i32
    %2 = arith.cmpi ne, %1, %c0_i32_0 : i32
    scf.if %2 {
      %cst_12 = arith.constant 0.000000e+00 : f32
      %35 = vector.broadcast %cst_12 : f32 to vector<8x128xf32>
      %c0_13 = arith.constant 0 : index
      %c0_14 = arith.constant 0 : index
      %c0_15 = arith.constant 0 : index
      %36 = vector.load %arg5[%c0_13, %c0_14, %c0_15] : memref<1x8x128xf32, #tpu.memory_space<vmem>>, vector<1x8x128xf32>
      %37 = vector.shape_cast %36 : vector<1x8x128xf32> to vector<8x128xf32>
      %38 = vector.shape_cast %35 : vector<8x128xf32> to vector<1x8x128xf32>
      tpu.vector_store %arg5[%c0_13, %c0_14, %c0_15], %38 {strides = array<i32>} : memref<1x8x128xf32, #tpu.memory_space<vmem>>, vector<1x8x128xf32>,
    } else {
    }
    %c0 = arith.constant 0 : index
    %c0_1 = arith.constant 0 : index
    %c0_2 = arith.constant 0 : index
    %3 = vector.load %arg2[%c0, %c0_1, %c0_2] : memref<1x256x8xbf16, #tpu.memory_space<vmem>>, vector<1x256x8xbf16>
    %4 = vector.shape_cast %3 : vector<1x256x8xbf16> to vector<256x8xbf16>
    %c0_3 = arith.constant 0 : index
    %c0_4 = arith.constant 0 : index
    %c0_5 = arith.constant 0 : index
    %5 = vector.load %arg3[%c0_3, %c0_4, %c0_5] : memref<1x16x8xbf16, #tpu.memory_space<vmem>>, vector<1x16x8xbf16>
    %6 = vector.shape_cast %5 : vector<1x16x8xbf16> to vector<16x8xbf16>
    %7 = tpu.concatenate %4, %6 in 0 : vector<256x8xbf16>, vector<16x8xbf16> -> vector<272x8xbf16>
    %8 = vector.extract_strided_slice %7 {offsets = [0, 0], sizes = [256, 8], strides = [1, 1]} : vector<272x8xbf16> to vector<256x8xbf16>
    %9 = vector.extract_strided_slice %7 {offsets = [1, 0], sizes = [256, 8], strides = [1, 1]} : vector<272x8xbf16> to vector<256x8xbf16>
    %10 = vector.extract_strided_slice %7 {offsets = [2, 0], sizes = [256, 8], strides = [1, 1]} : vector<272x8xbf16> to vector<256x8xbf16>
    %11 = vector.extract_strided_slice %7 {offsets = [3, 0], sizes = [256, 8], strides = [1, 1]} : vector<272x8xbf16> to vector<256x8xbf16>
    %12 = vector.extract_strided_slice %7 {offsets = [4, 0], sizes = [256, 8], strides = [1, 1]} : vector<272x8xbf16> to vector<256x8xbf16>
    %13 = vector.extract_strided_slice %7 {offsets = [5, 0], sizes = [256, 8], strides = [1, 1]} : vector<272x8xbf16> to vector<256x8xbf16>
    %14 = vector.extract_strided_slice %7 {offsets = [6, 0], sizes = [256, 8], strides = [1, 1]} : vector<272x8xbf16> to vector<256x8xbf16>
    %15 = vector.extract_strided_slice %7 {offsets = [7, 0], sizes = [256, 8], strides = [1, 1]} : vector<272x8xbf16> to vector<256x8xbf16>
    %16 = tpu.concatenate %8, %9, %10, %11, %12, %13, %14, %15 in 1 : vector<256x8xbf16>, vector<256x8xbf16>, vector<256x8xbf16>, vector<256x8xbf16>, vector<256x8xbf16>, vector<256x8xbf16>, vector<256x8xbf16>, vector<256x8xbf16> -> vector<256x64xbf16>
    %c0_6 = arith.constant 0 : index
    %c0_7 = arith.constant 0 : index
    %17 = vector.load %arg4[%c0_6, %c0_7] : memref<65x128xbf16, #tpu.memory_space<vmem>>, vector<64x128xbf16>
    %cst = arith.constant dense<0.000000e+00> : vector<256x128xf32>
    %18 = tpu.matmul %16, %17, %cst {dimension_numbers = #tpu.dot_dimension_numbers<[1], [0], [0], [1], [0, 0, 1, 1], [], []>} : vector<256x64xbf16>, vector<64x128xbf16>, vector<256x128xf32> -> vector<256x128xf32>
    %19 = vector.extract_strided_slice %7 {offsets = [8, 0], sizes = [256, 8], strides = [1, 1]} : vector<272x8xbf16> to vector<256x8xbf16>
    %20 = vector.extract_strided_slice %19 {offsets = [0, 0], sizes = [256, 1], strides = [1, 1]} : vector<256x8xbf16> to vector<256x1xbf16>
    %21 = arith.extf %20 : vector<256x1xbf16> to vector<256x1xf32>
    %c64 = arith.constant 64 : index
    %c0_8 = arith.constant 0 : index
    %22 = vector.load %arg4[%c64, %c0_8] : memref<65x128xbf16, #tpu.memory_space<vmem>>, vector<1x128xbf16>
    %23 = arith.extf %22 : vector<1x128xbf16> to vector<1x128xf32>
    %24 = vector.broadcast %21 : vector<256x1xf32> to vector<256x128xf32>
    %25 = vector.broadcast %23 : vector<1x128xf32> to vector<256x128xf32>
    %26 = arith.mulf %24, %25 : vector<256x128xf32>
    %27 = arith.addf %18, %26 : vector<256x128xf32>
    %28 = arith.mulf %27, %27 : vector<256x128xf32>
    %c3_i32 = arith.constant 3 : i32
    %29 = arith.cmpi slt, %arg1, %c3_i32 : i32
    %30 = arith.extui %29 : i1 to i32
    %c0_i32_9 = arith.constant 0 : i32
    %31 = arith.cmpi ne, %30, %c0_i32_9 : i32
    scf.if %31 {
      %c0_12 = arith.constant 0 : index
      %c0_13 = arith.constant 0 : index
      %c0_14 = arith.constant 0 : index
      %35 = vector.load %arg5[%c0_12, %c0_13, %c0_14] : memref<1x8x128xf32, #tpu.memory_space<vmem>>, vector<1x8x128xf32>
      %36 = vector.shape_cast %35 : vector<1x8x128xf32> to vector<8x128xf32>
      %37 = vector.shape_cast %28 : vector<256x128xf32> to vector<32x8x128xf32>
      %cst_15 = arith.constant dense<0.000000e+00> : vector<8x128xf32>
      %38 = vector.multi_reduction <add>, %37, %cst_15 [0] : vector<32x8x128xf32> to vector<8x128xf32>
      %39 = arith.addf %36, %38 : vector<8x128xf32>
      %c0_16 = arith.constant 0 : index
      %c0_17 = arith.constant 0 : index
      %c0_18 = arith.constant 0 : index
      %40 = vector.load %arg5[%c0_16, %c0_17, %c0_18] : memref<1x8x128xf32, #tpu.memory_space<vmem>>, vector<1x8x128xf32>
      %41 = vector.shape_cast %40 : vector<1x8x128xf32> to vector<8x128xf32>
      %42 = vector.shape_cast %39 : vector<8x128xf32> to vector<1x8x128xf32>
      tpu.vector_store %arg5[%c0_16, %c0_17, %c0_18], %42 {strides = array<i32>} : memref<1x8x128xf32, #tpu.memory_space<vmem>>, vector<1x8x128xf32>,
    } else {
    }
    %c3_i32_10 = arith.constant 3 : i32
    %32 = arith.cmpi eq, %arg1, %c3_i32_10 : i32
    %33 = arith.extui %32 : i1 to i32
    %c0_i32_11 = arith.constant 0 : i32
    %34 = arith.cmpi ne, %33, %c0_i32_11 : i32
    scf.if %34 {
      %c256_i32 = arith.constant 256 : i32
      %35 = arith.muli %arg1, %c256_i32 : i32
      %36 = tpu.iota {dimensions = array<i32: 0>} : vector<256x1xi32>
      %37 = vector.broadcast %35 : i32 to vector<256x1xi32>
      %38 = arith.addi %37, %36 : vector<256x1xi32>
      %c1000_i32 = arith.constant 1000 : i32
      %39 = vector.broadcast %c1000_i32 : i32 to vector<256x1xi32>
      %40 = arith.cmpi slt, %38, %39 : vector<256x1xi32>
      %cst_12 = arith.constant 0.000000e+00 : f32
      %41 = vector.shape_cast %40 : vector<256x1xi1> to vector<256x1xi1>
      %42 = vector.broadcast %41 : vector<256x1xi1> to vector<256x128xi1>
      %43 = vector.broadcast %cst_12 : f32 to vector<256x128xf32>
      %44 = arith.select %42, %28, %43 : vector<256x128xi1>, vector<256x128xf32>
      %c0_13 = arith.constant 0 : index
      %c0_14 = arith.constant 0 : index
      %c0_15 = arith.constant 0 : index
      %45 = vector.load %arg5[%c0_13, %c0_14, %c0_15] : memref<1x8x128xf32, #tpu.memory_space<vmem>>, vector<1x8x128xf32>
      %46 = vector.shape_cast %45 : vector<1x8x128xf32> to vector<8x128xf32>
      %47 = vector.shape_cast %44 : vector<256x128xf32> to vector<32x8x128xf32>
      %cst_16 = arith.constant dense<0.000000e+00> : vector<8x128xf32>
      %48 = vector.multi_reduction <add>, %47, %cst_16 [0] : vector<32x8x128xf32> to vector<8x128xf32>
      %49 = arith.addf %46, %48 : vector<8x128xf32>
      %c0_17 = arith.constant 0 : index
      %c0_18 = arith.constant 0 : index
      %c0_19 = arith.constant 0 : index
      %50 = vector.load %arg5[%c0_17, %c0_18, %c0_19] : memref<1x8x128xf32, #tpu.memory_space<vmem>>, vector<1x8x128xf32>
      %51 = vector.shape_cast %50 : vector<1x8x128xf32> to vector<8x128xf32>
      %52 = vector.shape_cast %49 : vector<8x128xf32> to vector<1x8x128xf32>
      tpu.vector_store %arg5[%c0_17, %c0_18, %c0_19], %52 {strides = array<i32>} : memref<1x8x128xf32, #tpu.memory_space<vmem>>, vector<1x8x128xf32>,
    } else {
    }
    return
  }
  func.func @transform_0(%arg0: i32, %arg1: i32) -> (i32, i32, i32) {
    %c0_i32 = arith.constant 0 : i32
    %c0_i32_0 = arith.constant 0 : i32
    return %arg0, %arg1, %c0_i32 : i32, i32, i32
  }
  func.func @transform_1(%arg0: i32, %arg1: i32) -> (i32, i32, i32) {
    %c1_i32 = arith.constant 1 : i32
    %0 = arith.addi %arg1, %c1_i32 : i32
    %c16_i32 = arith.constant 16 : i32
    %1 = arith.muli %0, %c16_i32 : i32
    %c0_i32 = arith.constant 0 : i32
    %c0_i32_0 = arith.constant 0 : i32
    return %arg0, %1, %c0_i32 : i32, i32, i32
  }
  func.func @transform_2(%arg0: i32, %arg1: i32) -> (i32, i32) {
    %c0_i32 = arith.constant 0 : i32
    %c0_i32_0 = arith.constant 0 : i32
    %c0_i32_1 = arith.constant 0 : i32
    return %c0_i32, %c0_i32_0 : i32, i32
  }
  func.func @transform_3(%arg0: i32, %arg1: i32) -> (i32, i32, i32) {
    %c0_i32 = arith.constant 0 : i32
    %c0_i32_0 = arith.constant 0 : i32
    %c0_i32_1 = arith.constant 0 : i32
    return %arg0, %c0_i32, %c0_i32_0 : i32, i32, i32
  }
}

</mosaic_0001>

<bundles_post_ra>
// kernel: tpu_custom_call.1
= control target key start
LH: loop header
LB: loop body
LE: loop exit
PB: predicated region body
PF: predicated region fallthrough
CT: control target
= control target key end

     0   :  { %8 = vsyncpa [#allocation3], 0  ;;  %s3980_s0 = inlined_call_operand.vmem [shape: bf16[4,1040,8], index: 0, kind: input, shape index: {}]   ;;  %s3981_s1 = inlined_call_operand.vmem [shape: bf16[4,1040,8], index: 1, kind: input, shape index: {}]   ;;  %s3982_s2 = inlined_call_operand.vmem [shape: bf16[65,128], index: 2, kind: input, shape index: {}]   ;;  %s3983_s3 = inlined_call_operand.hbm [shape: f32[4,8,128], index: 3, kind: output, shape index: {}]  }
   0x1   :  { %10 = vsyncpa [#allocation3 + $0x1], 0  ;;  %s2601_s12 = smov 0   ;;  %s2603_s13 = smov 0  }
   0x2   :  { %s2605_s14 = smov 0   ;;  %s2607_s15 = smov 0  }
   0x3   :  { %s2609_s16 = smov 0   ;;  %s2611_s17 = smov 0  }
   0x4   :  { %s2613_s18 = smov 0   ;;  %s2615_s19 = smov 0  }
   0x5 LB: > { %4024 = sst [smem:[#allocation5_spill]] %s2566_s18  ;;  %s2132_s20 = sadd.s32 4294967295, %s2570_s19   ;;  %s2570_s19 = sphi %s2615_s19, %s16_s19   ;;  %s2566_s18 = sphi %s2613_s18, %s4096_s18   ;;  %s2562_s17 = sphi %s2611_s17, %s4101_s17   ;;  %s2558_s16 = sphi %s2609_s16, %s4094_s16   ;;  %s2554_s15 = sphi %s2607_s15, %s4100_s15   ;;  %s2550_s14 = sphi %s2605_s14, %s4099_s14   ;;  %s2546_s13 = sphi %s2603_s13, %s4098_s13   ;;  %s2542_s12 = sphi %s2601_s12, %s4097_s12  }
   0x6   : > { %s2133_s21 = sadd.s32 4294967294, %s2570_s19   ;;  %s25_s22 = sadd.s32 1, %s2562_s17 }
   0x7   : > { %p26_p0 = scmp.ge.s32.totalorder %s25_s22, 4  ;;  %s28_s23 = sadd.s32 1, %s2566_s18 }
   0x8   : > { %p126_p1 = scmp.ne.s32.totalorder %s2550_s14, %s2546_s13  ;;  %p127_p2 = scmp.eq.s32.totalorder %s2132_s20, 15 }
   0x9   : > { %s4103_s22 = smov (%p26_p0, %s25_s22), 0  ;;  %s4105_s23 = smov (!%p26_p0, %s28_s23), %s2566_s18 }
   0xa   : > { %4025 = sst [smem:[#allocation6_spill]] %s4103_s22  ;;  %p2650_p3 = por %p127_p2, %p126_p1 }
   0xb   : > { %p132_p4 = scmp.ne.s32.totalorder %s2546_s13, %s2542_s12  ;;  %p30_p5 = scmp.ge.s32.totalorder %s4105_s23, 4 }
   0xc   : > { %p133_p6 = scmp.eq.s32.totalorder %s2133_s21, 15  ;;  %p2138_p7 = scmp.ge.s32.totalorder %s2570_s19, 1 }
   0xd   : > { %p192_p8 = scmp.lt.s32.totalorder %s2570_s19, 17  ;;  %s4107_s23 = smov (%p30_p5, %s4105_s23), 0 }
   0xe   : > { %4027 = sst [smem:[#allocation7_spill]] %s4107_s23  ;;  %p2660_p9 = por %p133_p6, %p132_p4 }
   0xf   : > { %p193_p10 = pnand %p2138_p7, %p192_p8  ;;  %s113_s26 = ssub.s32 %s2566_s18, %s4107_s23 }
  0x10   : > { %s116_s27 = sadd.s32 1, %s2550_s14  ;;  %p114_p11 = scmp.eq.s32.totalorder %s113_s26, 0 }
  0x11   : > { %196 = sbr.rel (%p193_p10) target bundleno = 784 (0x310), region = 32 }
  0x12   : > { %s2668_s28 = scalar_select %p114_p11, %s2550_s14, %s116_s27  }
  0x16   : > { %s3985_s29 = sand.u32 1, %s2546_s13   ;;  %s2140_s30 = sshll.u32 %s2554_s15, 5 }
  0x17   : > { %s2139_s4 = sshll.u32 %s3985_s29, 3  ;;  %p240_p12 = scmp.lt.s32.totalorder %s2558_s16, 3 }
  0x18   : > { %p242_p13 = scmp.lt.s32.totalorder %s2140_s30, 129  ;;  %s2282_s8 = sadd.s32 32, %s2140_s30 }
  0x19   : > { %s241_s5 = scalar_select %p240_p12, %s2558_s16, 3 }
  0x1a   : > { %s243_s6 = scalar_select %p242_p13, %s2140_s30, 129 }
  0x1b   : > { %s2295_s7 = smul.u32 130, %s241_s5  ;;  %p258_p0 = scmp.lt.s32.totalorder %s2282_s8, 129 }
  0x1c   : > { %s2686_s18 = scalar_lea.vmem [#allocation2], %s2139_s4  ;;  %p2145_p1 = scmp.ne.s32.totalorder %s2554_s15, 0 }
  0x1d   : > { %s245_s9 = sadd.s32 %s2295_s7, %s243_s6  ;;  %s4109_s8 = smov (!%p258_p0, %s2282_s8), 129 }
  0x1e   : > { %s2141_s10 = sshll.u32 %s245_s9, 2  ;;  %s261_s26 = sadd.s32 %s2295_s7, %s4109_s8 }
  0x1f   : > { %s2679_s21 = scalar_lea.vmem %s3980_s0, %s2141_s10  ;;  %s2144_s27 = sshll.u32 %s261_s26, 2 }
  0x20   : > { %s2684_s29 = scalar_lea.vmem %s3981_s1, %s2144_s27  ;;  %271 = sbr.rel (%p2145_p1) target bundleno = 39 (0x27), region = 36 }
  0x25   : > { %v2572_v0 = vmov 0.0  }
  0x26   : > { %272 = vst [vmem:[%s2686_s18] sm:$0xff] %v2572_v0 }
  0x27 PF: > { %v2691_v1 = vld [vmem:[%s2679_s21 + $0x20] sm:$0xff]  ;;  %v2694_v2 = vld [vmem:[%s2679_s21 + $0x28] sm:$0xff]  ;;  %v2697_v3 = vld [vmem:[%s2679_s21 + $0x10] sm:$0xff]  ;;  %vm392_vm0 = vsmask.f32 7424  ;;  %s2573_s22 = smov 8  }
  0x28   : > { %4029 = vst [vmem:[#allocation8_spill] sm:$0xff] %v2691_v1  ;;  %v2700_v4 = vld [vmem:[%s2679_s21 + $0x18] sm:$0xff]  ;;  %v2703_v5 = vld [vmem:[%s2679_s21] sm:$0xff]  ;;  %v2706_v6 = vld [vmem:[%s2679_s21 + $0x8] sm:$0xff]  ;;  %v2709_v7 = vshll.u32 %v2691_v1, 16  ;;  %v2712_v8 = vshrl.u32 %v2691_v1, 16 }
  0x29   : > { %4030 = vst [vmem:[#allocation9_spill] sm:$0xff] %v2703_v5  ;;  %v2715_v9 = vshll.u32 %v2694_v2, 16  ;;  %v2718_v10 = vshll.u32 %v2697_v3, 16  ;;  %v2721_v11 = vld [vmem:[%s2679_s21 + $0x30] sm:$0xff]  ;;  %v2724_v12 = vshrl.u32 %v2697_v3, 16  ;;  %v2727_v13 = vshll.u32 %v2700_v4, 16 }
  0x2a   : > { %4031 = vst [vmem:[#allocation10_spill] sm:$0xff] %v2706_v6  ;;  %v2730_v14 = vshrl.u32 %v2703_v5, 16  ;;  %v2733_v15 = vshll.u32 %v2703_v5, 16  ;;  %v427_v16 = vrot.slane %v2709_v7, 1  ;;  %v2739_v19 = vshll.u32 %v2706_v6, 16  ;;  %v2756_v28 = vld [vmem:[%s2679_s21 + $0x40] sm:$0xff] }
  0x2b   : > { %4032 = vst [vmem:[#allocation11_spill] sm:$0xff] %v2709_v7  ;;  %v435_v17 = vrot.slane %v2715_v9, 1  ;;  %v411_v18 = vrot.slane %v2718_v10, 1  ;;  %v419_v20 = vrot.slane %v2727_v13, 1  ;;  %v2744_v22 = vshrl.u32 %v2694_v2, 16  ;;  %v2759_v29 = vld [vmem:[%s2679_s21 + $0x38] sm:$0xff] }
  0x2c   : > { %4033 = vst [vmem:[#allocation12_spill] sm:$0xff] %v2712_v8  ;;  %v398_v21 = vrot.slane %v2733_v15, 1  ;;  %v2747_v23 = vshll.u32 %v2721_v11, 16  ;;  %v431_v24 = vor.u32 %v2712_v8, %v427_v16  ;;  %v403_v26 = vrot.slane %v2739_v19, 1  ;;  %v2775_v38 = vld [vmem:[%s2679_s21 + $0x48] sm:$0xff]  ;;  %v2790_v45 = vld [vmem:[%s2679_s21 + $0x58] sm:$0xff] }
  0x2d   : > { %4034 = vst [vmem:[#allocation13_spill] sm:$0xff] %v2715_v9  ;;  %v415_v25 = vor.u32 %v2724_v12, %v411_v18  ;;  %v2753_v27 = vshrl.u32 %v2700_v4, 16  ;;  %v2763_v31 = vshrl.u32 %v2706_v6, 16  ;;  %v439_v35 = vor.u32 %v2744_v22, %v435_v17  ;;  %v2801_v50 = vld [vmem:[%s2679_s21 + $0x50] sm:$0xff]  ;;  %v2810_v53 = vld [vmem:[%s2679_s21 + $0x60] sm:$0xff]  ;;  %s2574_s23 = smov 16  }
  0x2e   : > { %4035 = vst [vmem:[#allocation14_spill] sm:$0xff] %v2718_v10  ;;  %v399_v30 = vor.u32 %v398_v21, %v2730_v14  ;;  %v436_v32 = vsel %vm392_vm0, %v431_v24, %v435_v17  ;;  %v443_v36 = vrot.slane %v2747_v23, 1  ;;  %v2778_v39 = vshll.u32 %v2756_v28, 16  ;;  %s2575_s30 = smov 24   ;;  %s2576_s4 = smov 32  }
  0x2f   : > { %4036 = vst [vmem:[#allocation15_spill] sm:$0xff] %v2724_v12  ;;  %v420_v33 = vsel %vm392_vm0, %v415_v25, %v419_v20  ;;  %533 = vrot.lane.b32.xlu2 %v436_v32, %s2573_s22  ;;  %v423_v37 = vor.u32 %v2753_v27, %v419_v20  ;;  %v2781_v40 = vshll.u32 %v2759_v29, 16  ;;  %v407_v41 = vor.u32 %v2763_v31, %v403_v26  ;;  %v2840_v20 = vld [vmem:[%s2679_s21 + $0x68] sm:$0xff]  ;;  %s2577_s5 = smov 40   ;;  %s2578_s6 = smov 48  }
  0x30   : > { %4037 = vst [vmem:[#allocation16_spill] sm:$0xff] %v2730_v14  ;;  %529 = vrot.lane.b32.xlu1 %v420_v33, %s2573_s22  ;;  %v404_v34 = vsel %vm392_vm0, %v399_v30, %v403_v26  ;;  %v444_v42 = vsel %vm392_vm0, %v439_v35, %v443_v36  ;;  %v2787_v44 = vshrl.u32 %v2756_v28, 16  ;;  %v459_v46 = vrot.slane %v2778_v39, 1  ;;  %v2851_v30 = vld [vmem:[%s2679_s21 + $0x78] sm:$0xff]  ;;  %s2579_s7 = smov 56   ;;  %p2246_p2 = scmp.ge.s32.totalorder %s2554_s15, 3 }
  0x31   : > { %4038 = vst [vmem:[#allocation17_spill] sm:$0xff] %v2733_v15  ;;  %525 = vrot.lane.b32.xlu0 %v404_v34, %s2573_s22  ;;  %v428_v43 = vsel %vm392_vm0, %v423_v37, %v427_v16  ;;  %v2794_v47 = vshll.u32 %v2775_v38, 16  ;;  %v451_v48 = vrot.slane %v2781_v40, 1  ;;  %v2798_v49 = vshrl.u32 %v2759_v29, 16 }
  0x32   : > { %4039 = vst [vmem:[#allocation18_spill] sm:$0xff] %v2739_v19  ;;  %v412_v51 = vsel %vm392_vm0, %v407_v41, %v411_v18  ;;  %v2805_v52 = vshrl.u32 %v2721_v11, 16  ;;  %v2813_v54 = vshll.u32 %v2790_v45, 16  ;;  %v463_v55 = vor.u32 %v2787_v44, %v459_v46  ;;  %v2837_v18 = vld [vmem:[%s2679_s21 + $0x70] sm:$0xff] }
  0x33   : > { %4040 = vst [vmem:[#allocation19_spill] sm:$0xff] %v2747_v23  ;;  %v467_v56 = vrot.slane %v2794_v47, 1  ;;  %v455_v57 = vor.u32 %v2798_v49, %v451_v48  ;;  %v2820_v58 = vshll.u32 %v2801_v50, 16  ;;  %v2825_v61 = vshrl.u32 %v2790_v45, 16 }
  0x34   : > { %4041 = vst [vmem:[#allocation20_spill] sm:$0xff] %v2759_v29  ;;  %v447_v59 = vor.u32 %v2805_v52, %v443_v36  ;;  %v483_v60 = vrot.slane %v2813_v54, 1  ;;  %v2828_v62 = vshll.u32 %v2810_v53, 16  ;;  %v2834_v17 = vshrl.u32 %v2801_v50, 16 }
  0x35   : > { %4042 = vst [vmem:[#allocation21_spill] sm:$0xff] %v2763_v31  ;;  %v468_v63 = vsel %vm392_vm0, %v463_v55, %v467_v56  ;;  %v460_v0 = vsel %vm392_vm0, %v455_v57, %v459_v46  ;;  %v475_v16 = vrot.slane %v2820_v58, 1  ;;  %v2844_v24 = vshrl.u32 %v2775_v38, 16 }
  0x36   : > { %4043 = vst [vmem:[#allocation22_spill] sm:$0xff] %v2781_v40  ;;  %v452_v21 = vsel %vm392_vm0, %v447_v59, %v451_v48  ;;  %v487_v25 = vor.u32 %v2825_v61, %v483_v60  ;;  %v491_v26 = vrot.slane %v2828_v62, 1  ;;  %v2856_v33 = vshll.u32 %v2837_v18, 16 }
  0x37   : > { %4044 = vst [vmem:[#allocation23_spill] sm:$0xff] %v2801_v50  ;;  %535 = vrot.lane.b32.xlu2 %v444_v42, %s2573_s22  ;;  %v479_v32 = vor.u32 %v2834_v17, %v475_v16  ;;  %v2859_v34 = vshll.u32 %v2840_v20, 16  ;;  %v471_v35 = vor.u32 %v2844_v24, %v467_v56  ;;  %v2864_v37 = vshrl.u32 %v2837_v18, 16 }
  0x38   : > { %531 = vrot.lane.b32.xlu1 %v428_v43, %s2573_s22  ;;  %4045 = vst [vmem:[#allocation24_spill] sm:$0xff] %v2813_v54  ;;  %v492_v36 = vsel %vm392_vm0, %v487_v25, %v491_v26  ;;  %v2867_v41 = vshll.u32 %v2851_v30, 16  ;;  %v507_v43 = vrot.slane %v2856_v33, 1  ;;  %v2873_v48 = vshrl.u32 %v2840_v20, 16 }
  0x39   : > { %527 = vrot.lane.b32.xlu0 %v412_v51, %s2573_s22  ;;  %4046 = vst [vmem:[#allocation25_spill] sm:$0xff] %v2820_v58  ;;  %v484_v42 = vsel %vm392_vm0, %v479_v32, %v483_v60  ;;  %v499_v46 = vrot.slane %v2859_v34, 1  ;;  %v476_v51 = vsel %vm392_vm0, %v471_v35, %v475_v16  ;;  %v2877_v55 = vshrl.u32 %v2810_v53, 16 }
  0x3a   : > { %4047 = vst [vmem:[#allocation26_spill] sm:$0xff] %v2825_v61  ;;  %v511_v56 = vor.u32 %v2864_v37, %v507_v43  ;;  %v515_v57 = vrot.slane %v2867_v41, 1  ;;  %v2893_v25 = vshrl.u32 %v2851_v30, 16  ;;  %v561_v35 = vrot.slane %v2697_v3, 1 }
  0x3b   : > { %4048 = vst [vmem:[#allocation27_spill] sm:$0xff] %v2834_v17  ;;  %v503_v59 = vor.u32 %v2873_v48, %v499_v46  ;;  %v495_v60 = vor.u32 %v2877_v55, %v491_v26  ;;  %v559_v26 = vrot.slane %v2706_v6, 1  ;;  %vm557_vm1 = vcmask 1046528  }
  0x3c   : > { %4049 = vst [vmem:[#allocation28_spill] sm:$0xff] %v2837_v18  ;;  %vm623_vm2 = vsmask.f32 6400  ;;  %vm725_vm3 = vcmask 1045504   ;;  %vm1090_vm4 = vcmask 130048   ;;  %vm1057_vm5 = vcmask 64512  }
  0x3d   : > { %4050 = vst [vmem:[#allocation29_spill] sm:$0xff] %v2867_v41  ;;  %v508_v16 = vsel %vm392_vm0, %v503_v59, %v507_v43  ;;  %v565_v59 = vrot.slane %v2691_v1, 1  ;;  %vm791_vm6 = vsmask.f32 5376  ;;  %vm1123_vm7 = vcmask 195584  }
  0x3e   : > { %4051 = vst [vmem:[#allocation30_spill] sm:$0xff] %v2893_v25  ;;  %vm891_vm8 = vcmask 1044480   ;;  %vm1156_vm9 = vcmask 261120   ;;  %vm957_vm10 = vsmask.f32 4352  ;;  %vm1189_vm11 = vcmask 326656  }
  0x3f   : > { %541 = vrot.lane.b32.xlu2 %v468_v63, %s2573_s22  ;;  %v2887_v63 = vld [vmem:[%s2684_s29] sm:$0xff]  ;;  %vm1222_vm12 = vcmask 392192   ;;  %vm1296_vm13 = vcmask 1043456   ;;  %vm1597_vm14 = vcmask 523264   ;;  %vm1255_vm15 = vcmask 457728  }
  0x40   : > { %539 = vrot.lane.b32.xlu1 %v460_v0, %s2573_s22  ;;  %v516_v0 = vsel %vm392_vm0, %v511_v56, %v515_v57  ;;  %v2896_v32 = vshll.u32 %v2887_v63, 16 }
  0x41   : > { %537 = vrot.lane.b32.xlu0 %v452_v21, %s2573_s22  ;;  %v500_v21 = vsel %vm392_vm0, %v495_v60, %v499_v46  ;;  %v562_v46 = vsel %vm557_vm1, %v559_v26, %v561_v35  ;;  %v567_v60 = vrot.slane %v2694_v2, 1 }
  0x42   : > { %4052 = vst [vmem:[#allocation31_spill] sm:$0xff] %v2896_v32  ;;  %v523_v43 = vrot.slane %v2896_v32, 1 }
  0x47   : > { %547 = vrot.lane.b32.xlu2 %v492_v36, %s2573_s22  ;;  %v558_v36 = vrot.slane %v2703_v5, 1 }
  0x48   : > { %545 = vrot.lane.b32.xlu1 %v484_v42, %s2573_s22  ;;  %v519_v42 = vor.u32 %v2893_v25, %v515_v57  ;;  %v563_v57 = vrot.slane %v2700_v4, 1 }
  0x49   : > { %543 = vrot.lane.b32.xlu0 %v476_v51, %s2573_s22  ;;  %v560_v51 = vsel %vm557_vm1, %v558_v36, %v559_v26  ;;  %v571_v26 = vrot.slane %v2759_v29, 1  ;;  %v573_v36 = vrot.slane %v2756_v28, 1 }
  0x4a   : > { %v524_v56 = vsel %vm392_vm0, %v519_v42, %v523_v43  ;;  %v569_v42 = vrot.slane %v2721_v11, 1 }
  0x4b   : > { %v574_v43 = vsel %vm557_vm1, %v571_v26, %v573_v36 }
  0x4f   : > { %553 = vrot.lane.b32.xlu2 %v516_v0, %s2573_s22  ;;  %v568_v0 = vsel %vm557_vm1, %v565_v59, %v567_v60 }
  0x50   : > { %551 = vrot.lane.b32.xlu1 %v508_v16, %s2573_s22  ;;  %v566_v16 = vsel %vm557_vm1, %v563_v57, %v565_v59  ;;  %v575_v59 = vrot.slane %v2775_v38, 1 }
  0x51   : > { %549 = vrot.lane.b32.xlu0 %v500_v21, %s2573_s22  ;;  %v564_v21 = vsel %vm557_vm1, %v561_v35, %v563_v57  ;;  %v577_v35 = vrot.slane %v2801_v50, 1 }
  0x57   : > { %593 = vrot.lane.b32.xlu2 %v562_v46, %s2574_s23  ;;  %v572_v46 = vsel %vm557_vm1, %v569_v42, %v571_v26  ;;  %v581_v26 = vrot.slane %v2810_v53, 1 }
  0x58   : > { %591 = vrot.lane.b32.xlu1 %v560_v51, %s2574_s23  ;;  %v570_v51 = vsel %vm557_vm1, %v567_v60, %v569_v42  ;;  %v583_v60 = vrot.slane %v2840_v20, 1  ;;  %v624_v42 = vrot.slane %v2730_v14, 1 }
  0x59   : > { %555 = vrot.lane.b32.xlu0 %v524_v56, %s2573_s22  ;;  %v579_v56 = vrot.slane %v2790_v45, 1 }
  0x5b   : > { %v580_v57 = vsel %vm557_vm1, %v577_v35, %v579_v56 }
  0x5f   : > { %599 = vrot.lane.b32.xlu2 %v568_v0, %s2574_s23  ;;  %v578_v0 = vsel %vm557_vm1, %v575_v59, %v577_v35  ;;  %v584_v35 = vsel %vm557_vm1, %v581_v26, %v583_v60 }
  0x60   : > { %597 = vrot.lane.b32.xlu1 %v566_v16, %s2574_s23  ;;  %v576_v16 = vsel %vm557_vm1, %v573_v36, %v575_v59  ;;  %v628_v36 = vrot.slane %v2739_v19, 2  ;;  %v582_v59 = vsel %vm557_vm1, %v579_v56, %v581_v26  ;;  %v632_v56 = vrot.slane %v2718_v10, 2 }
  0x61   : > { %595 = vrot.lane.b32.xlu0 %v564_v21, %s2574_s23  ;;  %v585_v21 = vrot.slane %v2837_v18, 1  ;;  %v635_v26 = vrot.slane %v2753_v27, 1 }
  0x67   : > { %605 = vrot.lane.b32.xlu2 %v574_v43, %s2574_s23  ;;  %v625_v43 = vrot.slane %v2733_v15, 2 }
  0x68   : > { %603 = vrot.lane.b32.xlu1 %v572_v46, %s2574_s23  ;;  %v627_v46 = vrot.slane %v2763_v31, 1 }
  0x69   : > { %601 = vrot.lane.b32.xlu0 %v570_v51, %s2574_s23  ;;  %v586_v51 = vsel %vm557_vm1, %v583_v60, %v585_v21  ;;  %v631_v60 = vrot.slane %v2724_v12, 1 }
  0x6a   : > { %v629_v15 = vor.u32 %v628_v36, %v627_v46 }
  0x6b   : > { %v633_v46 = vor.u32 %v632_v56, %v631_v60 }
  0x6d   : > { %v634_v60 = vsel %vm623_vm2, %v629_v15, %v633_v46 }
  0x6f   : > { %611 = vrot.lane.b32.xlu2 %v580_v57, %s2574_s23  ;;  %v587_v57 = vrot.slane %v2851_v30, 1 }
  0x70   : > { %609 = vrot.lane.b32.xlu1 %v578_v0, %s2574_s23  ;;  %v589_v0 = vrot.slane %v2887_v63, 1 }
  0x71   : > { %607 = vrot.lane.b32.xlu0 %v576_v16, %s2574_s23  ;;  %v626_v16 = vor.u32 %v625_v43, %v624_v42  ;;  %v640_v42 = vrot.slane %v2709_v7, 2  ;;  %v588_v43 = vsel %vm557_vm1, %v585_v21, %v587_v57  ;;  %v648_v7 = vrot.slane %v2747_v23, 2 }
  0x72   : > { %v590_v19 = vsel %vm557_vm1, %v587_v57, %v589_v0  ;;  %v643_v0 = vrot.slane %v2744_v22, 1  ;;  %v651_v21 = vrot.slane %v2798_v49, 1 }
  0x73   : > { %v630_v31 = vsel %vm623_vm2, %v626_v16, %v629_v15  ;;  %v644_v16 = vrot.slane %v2715_v9, 2  ;;  %v659_v15 = vrot.slane %v2844_v24, 1 }
  0x75   : > { %v645_v56 = vor.u32 %v644_v16, %v643_v0  ;;  %v663_v0 = vrot.slane %v2834_v17, 1 }
  0x77   : > { %617 = vrot.lane.b32.xlu2 %v586_v51, %s2574_s23  ;;  %v636_v51 = vrot.slane %v2727_v13, 2 }
  0x78   : > { %615 = vrot.lane.b32.xlu1 %v584_v35, %s2574_s23  ;;  %v639_v35 = vrot.slane %v2712_v8, 1  ;;  %v647_v8 = vrot.slane %v2805_v52, 1 }
  0x79   : > { %613 = vrot.lane.b32.xlu0 %v582_v59, %s2574_s23  ;;  %v637_v36 = vor.u32 %v636_v51, %v635_v26 }
  0x7a   : > { %v641_v59 = vor.u32 %v640_v42, %v639_v35  ;;  %v649_v26 = vor.u32 %v648_v7, %v647_v8  ;;  %v664_v7 = vrot.slane %v2820_v58, 2  ;;  %v672_v58 = vrot.slane %v2828_v62, 2 }
  0x7b   : > { %v638_v57 = vsel %vm623_vm2, %v633_v46, %v637_v36  ;;  %v660_v46 = vrot.slane %v2794_v47, 2 }
  0x7c   : > { %v650_v42 = vsel %vm623_vm2, %v645_v56, %v649_v26  ;;  %v646_v8 = vsel %vm623_vm2, %v641_v59, %v645_v56  ;;  %v676_v56 = vrot.slane %v2859_v34, 2 }
  0x7f   : > { %693 = vrot.lane.b32.xlu2 %v630_v31, %s2575_s30  ;;  %v642_v31 = vsel %vm623_vm2, %v637_v36, %v641_v59  ;;  %v656_v36 = vrot.slane %v2778_v39, 2  ;;  %v675_v59 = vrot.slane %v2873_v48, 1 }
  0x80   : > { %621 = vrot.lane.b32.xlu1 %v590_v19, %s2574_s23  ;;  %v652_v19 = vrot.slane %v2781_v40, 2  ;;  %v655_v40 = vrot.slane %v2787_v44, 1 }
  0x81   : > { %619 = vrot.lane.b32.xlu0 %v588_v43, %s2574_s23 }
  0x82   : > { %v653_v51 = vor.u32 %v652_v19, %v651_v21  ;;  %v657_v16 = vor.u32 %v656_v36, %v655_v40  ;;  %v661_v21 = vor.u32 %v660_v46, %v659_v15  ;;  %v665_v19 = vor.u32 %v664_v7, %v663_v0 }
  0x83   : > { %v677_v46 = vor.u32 %v676_v56, %v675_v59  ;;  %v3007_v0 = vshrl.u32 %v2887_v63, 16 }
  0x84   : > { %v654_v43 = vsel %vm623_vm2, %v649_v26, %v653_v51  ;;  %v671_v26 = vrot.slane %v2877_v55, 1  ;;  %v666_v40 = vsel %vm623_vm2, %v661_v21, %v665_v19 }
  0x85   : > { %4053 = vst [vmem:[#allocation32_spill] sm:$0xff] %v3007_v0 }
  0x86   : > { %v673_v15 = vor.u32 %v672_v58, %v671_v26  ;;  %v684_v58 = vrot.slane %v2867_v41, 2 }
  0x87   : > { %699 = vrot.lane.b32.xlu2 %v642_v31, %s2575_s30  ;;  %v667_v31 = vrot.slane %v2825_v61, 1 }
  0x88   : > { %697 = vrot.lane.b32.xlu1 %v638_v57, %s2575_s30 }
  0x89   : > { %695 = vrot.lane.b32.xlu0 %v634_v60, %s2575_s30  ;;  %v2978_v35 = vpop.permute.xlu2 %533  ;;  %v668_v60 = vrot.slane %v2813_v54, 2 }
  0x8b   : > { %v669_v36 = vor.u32 %v668_v60, %v667_v31  ;;  %v689_v31 = vrot.slane %v3007_v0, 1  ;;  %v690_v60 = vrot.slane %v2896_v32, 2 }
  0x8d   : > { %v670_v26 = vsel %vm623_vm2, %v665_v19, %v669_v36 }
  0x8f   : > { %705 = vrot.lane.b32.xlu2 %v654_v43, %s2575_s30  ;;  %v658_v43 = vsel %vm623_vm2, %v653_v51, %v657_v16  ;;  %v679_v51 = vrot.slane %v2864_v37, 1 }
  0x90   : > { %703 = vrot.lane.b32.xlu1 %v650_v42, %s2575_s30  ;;  %v662_v42 = vsel %vm623_vm2, %v657_v16, %v661_v21  ;;  %v678_v21 = vsel %vm623_vm2, %v673_v15, %v677_v46  ;;  %v680_v16 = vrot.slane %v2856_v33, 2 }
  0x91   : > { %701 = vrot.lane.b32.xlu0 %v646_v8, %s2575_s30  ;;  %v2992_v57 = vpop.permute.xlu2 %535  ;;  %v674_v8 = vsel %vm623_vm2, %v669_v36, %v673_v15  ;;  %v727_v36 = vrot.slane %v2706_v6, 2 }
  0x92   : > { %v681_v59 = vor.u32 %v680_v16, %v679_v51 }
  0x94   : > { %v682_v19 = vsel %vm623_vm2, %v677_v46, %v681_v59 }
  0x97   : > { %711 = vrot.lane.b32.xlu2 %v666_v40, %s2575_s30  ;;  %v691_v40 = vor.u32 %v690_v60, %v689_v31  ;;  %v733_v31 = vrot.slane %v2691_v1, 2  ;;  %v735_v60 = vrot.slane %v2694_v2, 2 }
  0x98   : > { %709 = vrot.lane.b32.xlu1 %v662_v42, %s2575_s30  ;;  %v683_v42 = vrot.slane %v2893_v25, 1  ;;  %v4059_v25 = vld [vmem:[#allocation21_spill] sm:$0xff] }
  0x99   : > { %707 = vrot.lane.b32.xlu0 %v658_v43, %s2575_s30  ;;  %v3009_v7 = vpop.permute.xlu2 %541 }
  0x9a   : > { %v685_v56 = vor.u32 %v684_v58, %v683_v42  ;;  %v726_v42 = vrot.slane %v2703_v5, 2 }
  0x9c   : > { %v686_v0 = vsel %vm623_vm2, %v681_v59, %v685_v56  ;;  %v692_v32 = vsel %vm623_vm2, %v685_v56, %v691_v40  ;;  %v728_v58 = vsel %vm725_vm3, %v726_v42, %v727_v36 }
  0x9f   : > { %717 = vrot.lane.b32.xlu2 %v678_v21, %s2575_s30  ;;  %v731_v21 = vrot.slane %v2700_v4, 2 }
  0xa0   : > { %715 = vrot.lane.b32.xlu1 %v674_v8, %s2575_s30  ;;  %v729_v8 = vrot.slane %v2697_v3, 2 }
  0xa1   : > { %713 = vrot.lane.b32.xlu0 %v670_v26, %s2575_s30  ;;  %v3023_v43 = vpop.permute.xlu2 %547  ;;  %v737_v26 = vrot.slane %v2721_v11, 2 }
  0xa2   : > { %v3025_v15 = vpop.permute.xlu1 %529 }
  0xa3   : > { %v3027_v41 = vpop.permute.xlu0 %525  ;;  %v738_v42 = vsel %vm725_vm3, %v735_v60, %v737_v26 }
  0xa7   : > { %723 = vrot.lane.b32.xlu2 %v692_v32, %s2575_s30  ;;  %v732_v32 = vsel %vm725_vm3, %v729_v8, %v731_v21 }
  0xa8   : > { %721 = vrot.lane.b32.xlu1 %v686_v0, %s2575_s30  ;;  %v730_v0 = vsel %vm725_vm3, %v727_v36, %v729_v8  ;;  %v736_v8 = vsel %vm725_vm3, %v733_v31, %v735_v60 }
  0xa9   : > { %719 = vrot.lane.b32.xlu0 %v682_v19, %s2575_s30  ;;  %v3038_v51 = vpop.permute.xlu2 %553 }
  0xaa   : > { %4054 = vst [vmem:[#allocation33_spill] sm:$0xff] %v3038_v51  ;;  %v3040_v16 = vpop.permute.xlu1 %531  ;;  %v4060_v51 = vld [vmem:[#allocation18_spill] sm:$0xff] }
  0xab   : > { %v528_v46 = vpop.permute.xlu0 %527 }
  0xac   : > { %v1061_v59 = vsel %vm1057_vm5, %v2706_v6, %v528_v46  ;;  %v739_v46 = vrot.slane %v2759_v29, 2 }
  0xaf   : > { %763 = vrot.lane.b32.xlu2 %v732_v32, %s2576_s4  ;;  %v741_v32 = vrot.slane %v2756_v28, 2 }
  0xb0   : > { %761 = vrot.lane.b32.xlu1 %v730_v0, %s2576_s4  ;;  %v734_v0 = vsel %vm725_vm3, %v731_v21, %v733_v31 }
  0xb1   : > { %759 = vrot.lane.b32.xlu0 %v728_v58, %s2576_s4  ;;  %v594_v40 = vpop.permute.xlu2 %593  ;;  %v743_v58 = vrot.slane %v2775_v38, 2 }
  0xb2   : > { %v540_v56 = vpop.permute.xlu1 %539  ;;  %v3055_v19 = vsel %vm1090_vm4, %v1061_v59, %v594_v40  ;;  %v1067_v59 = vsel %vm1057_vm5, %v2691_v1, %v2978_v35  ;;  %v745_v35 = vrot.slane %v2801_v50, 2  ;;  %v747_v1 = vrot.slane %v2790_v45, 2 }
  0xb3   : > { %4055 = vst [vmem:[#allocation34_spill] sm:$0xff] %v3055_v19  ;;  %v3057_v36 = vpop.permute.xlu0 %537 }
  0xb7   : > { %769 = vrot.lane.b32.xlu2 %v738_v42, %s2576_s4  ;;  %v744_v42 = vsel %vm725_vm3, %v741_v32, %v743_v58 }
  0xb8   : > { %767 = vrot.lane.b32.xlu1 %v736_v8, %s2576_s4  ;;  %v742_v8 = vsel %vm725_vm3, %v739_v46, %v741_v32 }
  0xb9   : > { %765 = vrot.lane.b32.xlu0 %v734_v0, %s2576_s4  ;;  %v600_v60 = vpop.permute.xlu2 %599  ;;  %v740_v0 = vsel %vm725_vm3, %v737_v26, %v739_v46  ;;  %v748_v46 = vsel %vm725_vm3, %v745_v35, %v747_v1 }
  0xba   : > { %v546_v40 = vpop.permute.xlu1 %545  ;;  %v3072_v21 = vsel %vm1090_vm4, %v1067_v59, %v600_v60  ;;  %v749_v59 = vrot.slane %v2810_v53, 2  ;;  %v1073_v60 = vsel %vm1057_vm5, %v2759_v29, %v540_v56  ;;  %v751_v56 = vrot.slane %v2840_v20, 2 }
  0xbb   : > { %4056 = vst [vmem:[#allocation35_spill] sm:$0xff] %v3072_v21  ;;  %v3074_v31 = vpop.permute.xlu0 %543 }
  0xbf   : > { %775 = vrot.lane.b32.xlu2 %v744_v42, %s2576_s4  ;;  %v746_v42 = vsel %vm725_vm3, %v743_v58, %v745_v35 }
  0xc0   : > { %773 = vrot.lane.b32.xlu1 %v742_v8, %s2576_s4  ;;  %v750_v8 = vsel %vm725_vm3, %v747_v1, %v749_v59  ;;  %v1079_v1 = vsel %vm1057_vm5, %v2801_v50, %v546_v40  ;;  %v800_v40 = vrot.slane %v2718_v10, 3 }
  0xc1   : > { %771 = vrot.lane.b32.xlu0 %v740_v0, %s2576_s4  ;;  %v606_v19 = vpop.permute.xlu2 %605  ;;  %v753_v0 = vrot.slane %v2837_v18, 2  ;;  %v795_v18 = vrot.slane %v4059_v25, 2 }
  0xc2   : > { %v552_v21 = vpop.permute.xlu1 %551  ;;  %v3088_v32 = vsel %vm1090_vm4, %v1073_v60, %v606_v19  ;;  %v755_v19 = vrot.slane %v2851_v30, 2  ;;  %v1059_v60 = vsel %vm1057_vm5, %v2703_v5, %v3027_v41  ;;  %v796_v41 = vrot.slane %v4060_v51, 3 }
  0xc3   : > { %4057 = vst [vmem:[#allocation36_spill] sm:$0xff] %v3088_v32  ;;  %v3090_v26 = vpop.permute.xlu0 %549  ;;  %v799_v5 = vrot.slane %v2724_v12, 2  ;;  %v754_v50 = vsel %vm725_vm3, %v751_v56, %v753_v0  ;;  %v1085_v10 = vsel %vm1057_vm5, %v2840_v20, %v552_v21 }
  0xc7   : > { %781 = vrot.lane.b32.xlu2 %v750_v8, %s2576_s4  ;;  %v4058_v8 = vld [vmem:[#allocation17_spill] sm:$0xff] }
  0xc8   : > { %779 = vrot.lane.b32.xlu1 %v748_v46, %s2576_s4  ;;  %v792_v46 = vrot.slane %v2730_v14, 2  ;;  %v793_v32 = vrot.slane %v4058_v8, 3  ;;  %v756_v14 = vsel %vm725_vm3, %v753_v0, %v755_v19  ;;  %v752_v8 = vsel %vm725_vm3, %v749_v59, %v751_v56 }
  0xc9   : > { %777 = vrot.lane.b32.xlu0 %v746_v42, %s2576_s4  ;;  %v612_v58 = vpop.permute.xlu2 %611  ;;  %v757_v59 = vrot.slane %v2887_v63, 2  ;;  %v803_v56 = vrot.slane %v2753_v27, 2 }
  0xca   : > { %v592_v35 = vpop.permute.xlu1 %591  ;;  %v3109_v42 = vsel %vm1090_vm4, %v1079_v1, %v612_v58  ;;  %v794_v1 = vor.u32 %v793_v32, %v792_v46  ;;  %v797_v58 = vor.u32 %v796_v41, %v795_v18  ;;  %v804_v46 = vrot.slane %v2727_v13, 3 }
  0xcb   : > { %v1092_v29 = vsel %vm1090_vm4, %v1059_v60, %v592_v35  ;;  %v3112_v6 = vpop.permute.xlu0 %555  ;;  %v801_v60 = vor.u32 %v800_v40, %v799_v5  ;;  %v1065_v35 = vsel %vm1057_vm5, %v2700_v4, %v3040_v16 }
  0xcc   : > { %v798_v32 = vsel %vm791_vm6, %v794_v1, %v797_v58  ;;  %v805_v1 = vor.u32 %v804_v46, %v803_v56 }
  0xcd   : > { %v802_v21 = vsel %vm791_vm6, %v797_v58, %v801_v60 }
  0xcf   : > { %787 = vrot.lane.b32.xlu2 %v756_v14, %s2576_s4 }
  0xd0   : > { %785 = vrot.lane.b32.xlu1 %v754_v50, %s2576_s4  ;;  %v1063_v50 = vsel %vm1057_vm5, %v2697_v3, %v3025_v15  ;;  %v4062_v15 = vld [vmem:[#allocation11_spill] sm:$0xff] }
  0xd1   : > { %783 = vrot.lane.b32.xlu0 %v752_v8, %s2576_s4  ;;  %v618_v0 = vpop.permute.xlu2 %617  ;;  %v4061_v8 = vld [vmem:[#allocation12_spill] sm:$0xff]  ;;  %v808_v40 = vrot.slane %v4062_v15, 3 }
  0xd2   : > { %v598_v12 = vpop.permute.xlu1 %597  ;;  %v3134_v14 = vsel %vm1090_vm4, %v1085_v10, %v618_v0  ;;  %v807_v41 = vrot.slane %v4061_v8, 2  ;;  %v811_v10 = vrot.slane %v2744_v22, 2 }
  0xd3   : > { %v1098_v5 = vsel %vm1090_vm4, %v1065_v35, %v598_v12  ;;  %v596_v18 = vpop.permute.xlu0 %595  ;;  %v812_v12 = vrot.slane %v2715_v9, 3  ;;  %v758_v35 = vsel %vm725_vm3, %v755_v19, %v757_v59 }
  0xd4   : > { %v3139_v16 = vsel %vm1090_vm4, %v1063_v50, %v596_v18  ;;  %v809_v58 = vor.u32 %v808_v40, %v807_v41  ;;  %v1069_v50 = vsel %vm1057_vm5, %v2694_v2, %v2992_v57  ;;  %v1071_v18 = vsel %vm1057_vm5, %v2721_v11, %v3057_v36  ;;  %v4063_v40 = vld [vmem:[#allocation22_spill] sm:$0xff] }
  0xd5   : > { %v813_v0 = vor.u32 %v812_v12, %v811_v10  ;;  %v819_v41 = vrot.slane %v2798_v49, 2  ;;  %v820_v57 = vrot.slane %v4063_v40, 3  ;;  %v823_v36 = vrot.slane %v2787_v44, 2 }
  0xd6   : > { %v824_v12 = vrot.slane %v2778_v39, 3 }
  0xd7   : > { %861 = vrot.lane.b32.xlu2 %v802_v21, %s2577_s5  ;;  %v816_v21 = vrot.slane %v2747_v23, 3  ;;  %v814_v23 = vsel %vm791_vm6, %v809_v58, %v813_v0 }
  0xd8   : > { %859 = vrot.lane.b32.xlu1 %v798_v32, %s2577_s5  ;;  %v815_v32 = vrot.slane %v2805_v52, 2 }
  0xd9   : > { %789 = vrot.lane.b32.xlu0 %v758_v35, %s2576_s4  ;;  %v694_v59 = vpop.permute.xlu2 %693  ;;  %v810_v35 = vsel %vm791_vm6, %v805_v1, %v809_v58  ;;  %v1075_v58 = vsel %vm1057_vm5, %v2756_v28, %v3009_v7  ;;  %v4064_v7 = vld [vmem:[#allocation25_spill] sm:$0xff] }
  0xda   : > { %v604_v19 = vpop.permute.xlu1 %603  ;;  %v3162_v56 = vsel %vm1123_vm7, %v1092_v29, %v694_v59  ;;  %v817_v29 = vor.u32 %v816_v21, %v815_v32  ;;  %v825_v59 = vor.u32 %v824_v12, %v823_v36  ;;  %v831_v36 = vrot.slane %v2834_v17, 2 }
  0xdb   : > { %v1104_v9 = vsel %vm1090_vm4, %v1071_v18, %v604_v19  ;;  %v602_v46 = vpop.permute.xlu0 %601  ;;  %v806_v18 = vsel %vm791_vm6, %v801_v60, %v805_v1  ;;  %v821_v19 = vor.u32 %v820_v57, %v819_v41  ;;  %v828_v57 = vrot.slane %v2794_v47, 3 }
  0xdc   : > { %v3167_v10 = vsel %vm1090_vm4, %v1069_v50, %v602_v46  ;;  %v1077_v50 = vsel %vm1057_vm5, %v2775_v38, %v3074_v31  ;;  %v827_v31 = vrot.slane %v2844_v24, 2  ;;  %v832_v12 = vrot.slane %v4064_v7, 3  ;;  %v4066_v7 = vld [vmem:[#allocation28_spill] sm:$0xff] }
  0xdd   : > { %v826_v41 = vsel %vm791_vm6, %v821_v19, %v825_v59 }
  0xdf   : > { %867 = vrot.lane.b32.xlu2 %v814_v23, %s2577_s5  ;;  %v822_v23 = vsel %vm791_vm6, %v817_v29, %v821_v19  ;;  %v833_v19 = vor.u32 %v832_v12, %v831_v36  ;;  %v844_v36 = vrot.slane %v2859_v34, 3  ;;  %v848_v12 = vrot.slane %v2856_v33, 3 }
  0xe0   : > { %865 = vrot.lane.b32.xlu1 %v810_v35, %s2577_s5  ;;  %v835_v35 = vrot.slane %v2825_v61, 2  ;;  %v4065_v61 = vld [vmem:[#allocation33_spill] sm:$0xff] }
  0xe1   : > { %863 = vrot.lane.b32.xlu0 %v806_v18, %s2577_s5  ;;  %v700_v40 = vpop.permute.xlu2 %699  ;;  %v829_v18 = vor.u32 %v828_v57, %v827_v31  ;;  %v840_v31 = vrot.slane %v2828_v62, 3  ;;  %v843_v57 = vrot.slane %v2873_v48, 2 }
  0xe2   : > { %v610_v46 = vpop.permute.xlu1 %609  ;;  %v3185_v1 = vsel %vm1123_vm7, %v1098_v5, %v700_v40  ;;  %v836_v5 = vrot.slane %v2813_v54, 3  ;;  %v818_v40 = vsel %vm791_vm6, %v813_v0, %v817_v29  ;;  %v839_v0 = vrot.slane %v2877_v55, 2 }
  0xe3   : > { %v1110_v60 = vsel %vm1090_vm4, %v1077_v50, %v610_v46  ;;  %v608_v32 = vpop.permute.xlu0 %607  ;;  %v1081_v46 = vsel %vm1057_vm5, %v2790_v45, %v3023_v43 }
  0xe4   : > { %v3189_v21 = vsel %vm1090_vm4, %v1075_v58, %v608_v32  ;;  %v837_v50 = vor.u32 %v836_v5, %v835_v35  ;;  %v1083_v58 = vsel %vm1057_vm5, %v2810_v53, %v3090_v26  ;;  %v847_v26 = vrot.slane %v2864_v37, 2 }
  0xe5   : > { %v834_v35 = vsel %vm791_vm6, %v829_v18, %v833_v19 }
  0xe6   : > { %v838_v5 = vsel %vm791_vm6, %v833_v19, %v837_v50  ;;  %v1087_v19 = vsel %vm1057_vm5, %v4066_v7, %v4065_v61  ;;  %v4070_v61 = vld [vmem:[#allocation31_spill] sm:$0xff] }
  0xe7   : > { %873 = vrot.lane.b32.xlu2 %v826_v41, %s2577_s5  ;;  %v856_v17 = vrot.slane %v4070_v61, 3 }
  0xe8   : > { %871 = vrot.lane.b32.xlu1 %v822_v23, %s2577_s5 }
  0xe9   : > { %869 = vrot.lane.b32.xlu0 %v818_v40, %s2577_s5  ;;  %v706_v54 = vpop.permute.xlu2 %705  ;;  %v845_v40 = vor.u32 %v844_v36, %v843_v57 }
  0xea   : > { %v616_v32 = vpop.permute.xlu1 %615  ;;  %v3211_v23 = vsel %vm1123_vm7, %v1104_v9, %v706_v54  ;;  %v830_v9 = vsel %vm791_vm6, %v825_v59, %v829_v18  ;;  %v841_v54 = vor.u32 %v840_v31, %v839_v0 }
  0xeb   : > { %v1116_v29 = vsel %vm1090_vm4, %v1083_v58, %v616_v32  ;;  %v614_v41 = vpop.permute.xlu0 %613  ;;  %v1089_v58 = vsel %vm1057_vm5, %v2851_v30, %v3112_v6  ;;  %v4067_v6 = vld [vmem:[#allocation30_spill] sm:$0xff] }
  0xec   : > { %v3216_v43 = vsel %vm1090_vm4, %v1081_v46, %v614_v41  ;;  %v849_v46 = vor.u32 %v848_v12, %v847_v26  ;;  %v846_v57 = vsel %vm791_vm6, %v841_v54, %v845_v40  ;;  %v851_v26 = vrot.slane %v4067_v6, 2  ;;  %v4068_v12 = vld [vmem:[#allocation29_spill] sm:$0xff] }
  0xee   : > { %v850_v36 = vsel %vm791_vm6, %v845_v40, %v849_v46 }
  0xef   : > { %879 = vrot.lane.b32.xlu2 %v838_v5, %s2577_s5  ;;  %v4069_v5 = vld [vmem:[#allocation32_spill] sm:$0xff] }
  0xf0   : > { %877 = vrot.lane.b32.xlu1 %v834_v35, %s2577_s5  ;;  %v852_v35 = vrot.slane %v4068_v12, 3 }
  0xf1   : > { %875 = vrot.lane.b32.xlu0 %v830_v9, %s2577_s5  ;;  %v712_v41 = vpop.permute.xlu2 %711  ;;  %v855_v9 = vrot.slane %v4069_v5, 2 }
  0xf2   : > { %v622_v32 = vpop.permute.xlu1 %621  ;;  %v3235_v18 = vsel %vm1123_vm7, %v1110_v60, %v712_v41  ;;  %v853_v60 = vor.u32 %v852_v35, %v851_v26  ;;  %v4071_v41 = vld [vmem:[#allocation9_spill] sm:$0xff] }
  0xf3   : > { %v1122_v59 = vsel %vm1090_vm4, %v1089_v58, %v622_v32  ;;  %v620_v0 = vpop.permute.xlu0 %619  ;;  %v842_v58 = vsel %vm791_vm6, %v837_v50, %v841_v54  ;;  %v857_v32 = vor.u32 %v856_v17, %v855_v9  ;;  %v892_v40 = vrot.slane %v4071_v41, 3  ;;  %v4075_v41 = vld [vmem:[#allocation35_spill] sm:$0xff] }
  0xf4   : > { %v3238_v31 = vsel %vm1090_vm4, %v1087_v19, %v620_v0  ;;  %v4072_v19 = vld [vmem:[#allocation10_spill] sm:$0xff]  ;;  %v854_v35 = vsel %vm791_vm6, %v849_v46, %v853_v60 }
  0xf5   : > { %v893_v0 = vrot.slane %v4072_v19, 3  ;;  %v858_v17 = vsel %vm791_vm6, %v853_v60, %v857_v32 }
  0xf7   : > { %885 = vrot.lane.b32.xlu2 %v850_v36, %s2577_s5  ;;  %v894_v26 = vsel %vm891_vm8, %v892_v40, %v893_v0 }
  0xf8   : > { %883 = vrot.lane.b32.xlu1 %v846_v57, %s2577_s5  ;;  %v4073_v57 = vld [vmem:[#allocation34_spill] sm:$0xff] }
  0xf9   : > { %881 = vrot.lane.b32.xlu0 %v842_v58, %s2577_s5  ;;  %v718_v12 = vpop.permute.xlu2 %717 }
  0xfa   : > { %v698_v6 = vpop.permute.xlu1 %697  ;;  %v3255_v50 = vsel %vm1123_vm7, %v1116_v29, %v718_v12  ;;  %v897_v29 = vrot.slane %v2700_v4, 3 }
  0xfb   : > { %v1129_v61 = vsel %vm1123_vm7, %v3139_v16, %v698_v6  ;;  %v696_v54 = vpop.permute.xlu0 %695  ;;  %v895_v16 = vrot.slane %v2697_v3, 3  ;;  %v4074_v6 = vld [vmem:[#allocation8_spill] sm:$0xff] }
  0xfc   : > { %v3259_v36 = vsel %vm1123_vm7, %v4073_v57, %v696_v54  ;;  %v899_v12 = vrot.slane %v4074_v6, 3  ;;  %v4076_v54 = vld [vmem:[#allocation20_spill] sm:$0xff] }
  0xfd   : > { %v898_v19 = vsel %vm891_vm8, %v895_v16, %v897_v29  ;;  %v896_v4 = vsel %vm891_vm8, %v893_v0, %v895_v16  ;;  %v905_v57 = vrot.slane %v4076_v54, 3  ;;  %v917_v54 = vrot.slane %v2840_v20, 3 }
  0xfe   : > { %v900_v3 = vsel %vm891_vm8, %v897_v29, %v899_v12  ;;  %v4077_v29 = vld [vmem:[#allocation36_spill] sm:$0xff]  ;;  %v919_v20 = vrot.slane %v4066_v7, 3 }
  0xff   : > { %925 = vrot.lane.b32.xlu2 %v894_v26, %s2578_s6 }
 0x100   : > { %889 = vrot.lane.b32.xlu1 %v858_v17, %s2577_s5 }
 0x101   : > { %887 = vrot.lane.b32.xlu0 %v854_v35, %s2577_s5  ;;  %v724_v58 = vpop.permute.xlu2 %723 }
 0x102   : > { %v704_v9 = vpop.permute.xlu1 %703  ;;  %v3273_v46 = vsel %vm1123_vm7, %v1122_v59, %v724_v58  ;;  %v903_v59 = vrot.slane %v2721_v11, 3  ;;  %v4078_v58 = vld [vmem:[#allocation23_spill] sm:$0xff] }
 0x103   : > { %v1135_v32 = vsel %vm1123_vm7, %v3167_v10, %v704_v9  ;;  %v702_v60 = vpop.permute.xlu0 %701  ;;  %v901_v10 = vrot.slane %v2694_v2, 3 }
 0x104   : > { %v3277_v40 = vsel %vm1123_vm7, %v4075_v41, %v702_v60  ;;  %v906_v2 = vsel %vm891_vm8, %v903_v59, %v905_v57  ;;  %v911_v60 = vrot.slane %v4078_v58, 3 }
 0x105   : > { %v904_v9 = vsel %vm891_vm8, %v901_v10, %v903_v59  ;;  %v902_v11 = vsel %vm891_vm8, %v899_v12, %v901_v10 }
 0x107   : > { %931 = vrot.lane.b32.xlu2 %v900_v3, %s2578_s6 }
 0x108   : > { %929 = vrot.lane.b32.xlu1 %v898_v19, %s2578_s6 }
 0x109   : > { %927 = vrot.lane.b32.xlu0 %v896_v4, %s2578_s6  ;;  %v764_v26 = vpop.permute.xlu2 %763 }
 0x10a   : > { %v710_v17 = vpop.permute.xlu1 %709  ;;  %v3291_v0 = vsel %vm1156_vm9, %v1129_v61, %v764_v26  ;;  %v909_v61 = vrot.slane %v2775_v38, 3 }
 0x10b   : > { %v1141_v35 = vsel %vm1123_vm7, %v3189_v21, %v710_v17  ;;  %v708_v16 = vpop.permute.xlu0 %707  ;;  %v907_v21 = vrot.slane %v2756_v28, 3 }
 0x10c   : > { %v3295_v6 = vsel %vm1123_vm7, %v4077_v29, %v708_v16  ;;  %v912_v28 = vsel %vm891_vm8, %v909_v61, %v911_v60 }
 0x10d   : > { %v910_v59 = vsel %vm891_vm8, %v907_v21, %v909_v61  ;;  %v908_v38 = vsel %vm891_vm8, %v905_v57, %v907_v21 }
 0x10f   : > { %937 = vrot.lane.b32.xlu2 %v906_v2, %s2578_s6  ;;  %v921_v2 = vrot.slane %v2851_v30, 3 }
 0x110   : > { %935 = vrot.lane.b32.xlu1 %v904_v9, %s2578_s6 }
 0x111   : > { %933 = vrot.lane.b32.xlu0 %v902_v11, %s2578_s6  ;;  %v770_v19 = vpop.permute.xlu2 %769  ;;  %v922_v7 = vsel %vm891_vm8, %v919_v20, %v921_v2 }
 0x112   : > { %v716_v41 = vpop.permute.xlu1 %715  ;;  %v3309_v4 = vsel %vm1156_vm9, %v1135_v32, %v770_v19  ;;  %v915_v32 = vrot.slane %v2810_v53, 3 }
 0x113   : > { %v1147_v3 = vsel %vm1123_vm7, %v3216_v43, %v716_v41  ;;  %v714_v12 = vpop.permute.xlu0 %713  ;;  %v913_v43 = vrot.slane %v2790_v45, 3  ;;  %v4079_v41 = vld [vmem:[#allocation15_spill] sm:$0xff] }
 0x114   : > { %v3313_v10 = vsel %vm1123_vm7, %v3109_v42, %v714_v12  ;;  %v918_v45 = vsel %vm891_vm8, %v915_v32, %v917_v54  ;;  %v965_v19 = vrot.slane %v4079_v41, 3  ;;  %v4080_v12 = vld [vmem:[#allocation14_spill] sm:$0xff] }
 0x115   : > { %v916_v9 = vsel %vm891_vm8, %v913_v43, %v915_v32  ;;  %v914_v53 = vsel %vm891_vm8, %v911_v60, %v913_v43  ;;  %v962_v60 = vrot.slane %v4060_v51, 4 }
 0x117   : > { %943 = vrot.lane.b32.xlu2 %v912_v28, %s2578_s6  ;;  %v920_v28 = vsel %vm891_vm8, %v917_v54, %v919_v20  ;;  %v990_v54 = vrot.slane %v2778_v39, 4  ;;  %v1009_v39 = vrot.slane %v2873_v48, 3 }
 0x118   : > { %941 = vrot.lane.b32.xlu1 %v910_v59, %s2578_s6  ;;  %v970_v59 = vrot.slane %v2727_v13, 4  ;;  %v989_v13 = vrot.slane %v2787_v44, 3  ;;  %v1006_v44 = vrot.slane %v2828_v62, 4 }
 0x119   : > { %939 = vrot.lane.b32.xlu0 %v908_v38, %s2578_s6  ;;  %v776_v17 = vpop.permute.xlu2 %775  ;;  %v4081_v38 = vld [vmem:[#allocation16_spill] sm:$0xff] }
 0x11a   : > { %v722_v42 = vpop.permute.xlu1 %721  ;;  %v3327_v16 = vsel %vm1156_vm9, %v1141_v35, %v776_v17  ;;  %v958_v43 = vrot.slane %v4081_v38, 3  ;;  %v4085_v38 = vld [vmem:[#allocation22_spill] sm:$0xff] }
 0x11b   : > { %v1153_v26 = vsel %vm1123_vm7, %v3238_v31, %v722_v42  ;;  %v720_v57 = vpop.permute.xlu0 %719  ;;  %v923_v31 = vrot.slane %v2887_v63, 3  ;;  %v961_v63 = vrot.slane %v4059_v25, 3 }
 0x11c   : > { %v3331_v29 = vsel %vm1123_vm7, %v3134_v14, %v720_v57 }
 0x11d   : > { %v924_v58 = vsel %vm891_vm8, %v921_v2, %v923_v31  ;;  %v963_v25 = vor.u32 %v962_v60, %v961_v63  ;;  %v994_v2 = vrot.slane %v2794_v47, 4  ;;  %v1005_v31 = vrot.slane %v2877_v55, 3 }
 0x11e   : > { %v973_v47 = vrot.slane %v4061_v8, 3  ;;  %v974_v55 = vrot.slane %v4062_v15, 4 }
 0x11f   : > { %949 = vrot.lane.b32.xlu2 %v918_v45, %s2578_s6  ;;  %v3389_v62 = vor.u32 %v1006_v44, %v1005_v31 }
 0x120   : > { %947 = vrot.lane.b32.xlu1 %v916_v9, %s2578_s6  ;;  %v993_v9 = vrot.slane %v2844_v24, 3  ;;  %v1010_v24 = vrot.slane %v2859_v34, 4 }
 0x121   : > { %945 = vrot.lane.b32.xlu0 %v914_v53, %s2578_s6  ;;  %v782_v35 = vpop.permute.xlu2 %781 }
 0x122   : > { %v762_v14 = vpop.permute.xlu1 %761  ;;  %v3345_v21 = vsel %vm1156_vm9, %v1147_v3, %v782_v35  ;;  %v969_v3 = vrot.slane %v2753_v27, 3  ;;  %v1011_v34 = vor.u32 %v1010_v24, %v1009_v39 }
 0x123   : > { %v1160_v11 = vsel %vm1156_vm9, %v3259_v36, %v762_v14  ;;  %v760_v61 = vpop.permute.xlu0 %759  ;;  %v966_v36 = vrot.slane %v4080_v12, 4  ;;  %v977_v12 = vrot.slane %v2744_v22, 3 }
 0x124   : > { %v3350_v30 = vsel %vm1156_vm9, %v3162_v56, %v760_v61  ;;  %v4082_v56 = vld [vmem:[#allocation17_spill] sm:$0xff]  ;;  %v971_v42 = vor.u32 %v970_v59, %v969_v3  ;;  %v991_v61 = vor.u32 %v990_v54, %v989_v13  ;;  %v981_v59 = vrot.slane %v2805_v52, 3 }
 0x125   : > { %v959_v32 = vrot.slane %v4082_v56, 4  ;;  %v967_v51 = vor.u32 %v966_v36, %v965_v19  ;;  %v1012_v19 = vsel %vm957_vm10, %v3389_v62, %v1011_v34  ;;  %v4083_v36 = vld [vmem:[#allocation13_spill] sm:$0xff] }
 0x126   : > { %v978_v3 = vrot.slane %v4083_v36, 4 }
 0x127   : > { %955 = vrot.lane.b32.xlu2 %v924_v58, %s2578_s6  ;;  %v960_v57 = vor.u32 %v959_v32, %v958_v43  ;;  %v975_v58 = vor.u32 %v974_v55, %v973_v47  ;;  %v986_v43 = vrot.slane %v4085_v38, 4  ;;  %v4088_v47 = vld [vmem:[#allocation26_spill] sm:$0xff]  ;;  %v4092_v38 = vld [vmem:[#allocation31_spill] sm:$0xff] }
 0x128   : > { %953 = vrot.lane.b32.xlu1 %v922_v7, %s2578_s6  ;;  %v995_v7 = vor.u32 %v994_v2, %v993_v9  ;;  %v4087_v2 = vld [vmem:[#allocation25_spill] sm:$0xff]  ;;  %v1001_v55 = vrot.slane %v4088_v47, 3  ;;  %v3524_v47 = vld [vmem:[%s2679_s21 + $0x10] sm:$0xff] }
 0x129   : > { %951 = vrot.lane.b32.xlu0 %v920_v28, %s2578_s6  ;;  %v788_v27 = vpop.permute.xlu2 %787  ;;  %v964_v35 = vsel %vm957_vm10, %v960_v57, %v963_v25  ;;  %v976_v56 = vsel %vm957_vm10, %v971_v42, %v975_v58  ;;  %v1014_v57 = vrot.slane %v2856_v33, 4 }
 0x12a   : > { %v768_v17 = vpop.permute.xlu1 %767  ;;  %v3371_v53 = vsel %vm1156_vm9, %v1153_v26, %v788_v27  ;;  %v972_v26 = vsel %vm957_vm10, %v967_v51, %v971_v42  ;;  %v996_v60 = vsel %vm957_vm10, %v991_v61, %v995_v7  ;;  %v1013_v27 = vrot.slane %v2864_v37, 3 }
 0x12b   : > { %v1166_v45 = vsel %vm1156_vm9, %v3277_v40, %v768_v17  ;;  %v766_v20 = vpop.permute.xlu0 %765  ;;  %v968_v40 = vsel %vm957_vm10, %v963_v25, %v967_v51 }
 0x12c   : > { %v3377_v14 = vsel %vm1156_vm9, %v3185_v1, %v766_v20  ;;  %v4086_v20 = vld [vmem:[#allocation27_spill] sm:$0xff] }
 0x12f   : > { %1029 = vrot.lane.b32.xlu2 %v972_v26, %s2579_s7 }
 0x130   : > { %1027 = vrot.lane.b32.xlu1 %v968_v40, %s2579_s7 }
 0x131   : > { %1025 = vrot.lane.b32.xlu0 %v964_v35, %s2579_s7  ;;  %v862_v1 = vpop.permute.xlu2 %861 }
 0x132   : > { %v774_v48 = vpop.permute.xlu1 %773  ;;  %v3395_v15 = vsel %vm1189_vm11, %v1160_v11, %v862_v1  ;;  %v985_v11 = vrot.slane %v2798_v49, 3 }
 0x133   : > { %v1172_v8 = vsel %vm1156_vm9, %v3295_v6, %v774_v48  ;;  %v772_v63 = vpop.permute.xlu0 %771  ;;  %v4084_v6 = vld [vmem:[#allocation19_spill] sm:$0xff]  ;;  %v4089_v48 = vld [vmem:[#allocation24_spill] sm:$0xff] }
 0x134   : > { %v3400_v41 = vsel %vm1156_vm9, %v3211_v23, %v772_v63  ;;  %v982_v28 = vrot.slane %v4084_v6, 4  ;;  %v979_v23 = vor.u32 %v978_v3, %v977_v12  ;;  %v987_v32 = vor.u32 %v986_v43, %v985_v11 }
 0x135   : > { %v1002_v1 = vrot.slane %v4089_v48, 4  ;;  %v1021_v11 = vrot.slane %v4069_v5, 3  ;;  %v1022_v43 = vrot.slane %v4092_v38, 4 }
 0x136   : > { %v983_v22 = vor.u32 %v982_v28, %v981_v59  ;;  %v980_v9 = vsel %vm957_vm10, %v975_v58, %v979_v23  ;;  %v992_v35 = vsel %vm957_vm10, %v987_v32, %v991_v61  ;;  %v4090_v58 = vld [vmem:[#allocation30_spill] sm:$0xff] }
 0x137   : > { %1049 = vrot.lane.b32.xlu2 %v1012_v19, %s2579_s7  ;;  %v1017_v63 = vrot.slane %v4090_v58, 3 }
 0x138   : > { %1041 = vrot.lane.b32.xlu1 %v996_v60, %s2579_s7  ;;  %v984_v13 = vsel %vm957_vm10, %v979_v23, %v983_v22  ;;  %v988_v54 = vsel %vm957_vm10, %v983_v22, %v987_v32  ;;  %v4091_v60 = vld [vmem:[#allocation29_spill] sm:$0xff] }
 0x139   : > { %1031 = vrot.lane.b32.xlu0 %v976_v56, %s2579_s7  ;;  %v868_v51 = vpop.permute.xlu2 %867 }
 0x13a   : > { %v780_v25 = vpop.permute.xlu1 %779  ;;  %v3417_v49 = vsel %vm1189_vm11, %v1166_v45, %v868_v51  ;;  %v998_v45 = vrot.slane %v4087_v2, 4 }
 0x13b   : > { %v1178_v52 = vsel %vm1156_vm9, %v3313_v10, %v780_v25  ;;  %v778_v17 = vpop.permute.xlu0 %777  ;;  %v997_v10 = vrot.slane %v4086_v20, 3  ;;  %v2280_v20 = vld [vmem:[%s3982_s2 + $0x18] sm:$0xff] }
 0x13c   : > { %v3421_v42 = vsel %vm1156_vm9, %v3235_v18, %v778_v17  ;;  %v1015_v18 = vor.u32 %v1014_v57, %v1013_v27  ;;  %2285 = vmatpush.bf16.msra.mxu3 %v2280_v20  ;;  %1634 = vmatpush.bf16.msra.mxu0 %v2280_v20 }
 0x13d   : > { %v999_v33 = vor.u32 %v998_v45, %v997_v10  ;;  %2284 = vmatpush.bf16.msra.mxu2 %v2280_v20  ;;  %2283 = vmatpush.bf16.msra.mxu1 %v2280_v20 }
 0x13e   : > { %v1016_v26 = vsel %vm957_vm10, %v1011_v34, %v1015_v18 }
 0x13f   : > { %1037 = vrot.lane.b32.xlu2 %v988_v54, %s2579_s7 }
 0x140   : > { %1035 = vrot.lane.b32.xlu1 %v984_v13, %s2579_s7 }
 0x141   : > { %1033 = vrot.lane.b32.xlu0 %v980_v9, %s2579_s7  ;;  %v874_v31 = vpop.permute.xlu2 %873 }
 0x142   : > { %v786_v37 = vpop.permute.xlu1 %785  ;;  %v3436_v39 = vsel %vm1189_vm11, %v1172_v8, %v874_v31  ;;  %v1000_v8 = vsel %vm957_vm10, %v995_v7, %v999_v33 }
 0x143   : > { %v1184_v44 = vsel %vm1156_vm9, %v3331_v29, %v786_v37  ;;  %v784_v24 = vpop.permute.xlu0 %783  ;;  %v1018_v29 = vrot.slane %v4091_v60, 4  ;;  %v2277_v37 = vld [vmem:[%s3982_s2] sm:$0xff] }
 0x144   : > { %v3440_v40 = vsel %vm1156_vm9, %v3255_v50, %v784_v24  ;;  %v1003_v50 = vor.u32 %v1002_v1, %v1001_v55  ;;  %v1300_v55 = vrot.slane %v3524_v47, 4  ;;  %v2580_v1 = vmov 0  }
 0x145   : > { %v1019_v34 = vor.u32 %v1018_v29, %v1017_v63  ;;  %2382 = vset.pattern.permute.xlu2 %v2580_v1  ;;  %2376 = vset.pattern.permute.xlu1 %v2580_v1 }
 0x146   : > { %v1008_v59 = vsel %vm957_vm10, %v1003_v50, %v3389_v62  ;;  %v1004_v28 = vsel %vm957_vm10, %v999_v33, %v1003_v50  ;;  %2388 = vset.pattern.permute.xlu0 %v2580_v1 }
 0x147   : > { %1039 = vrot.lane.b32.xlu2 %v992_v35, %s2579_s7  ;;  %v1020_v6 = vsel %vm957_vm10, %v1015_v18, %v1019_v34  ;;  %v2278_v18 = vld [vmem:[%s3982_s2 + $0x8] sm:$0xff] }
 0x148   : > { %1051 = vrot.lane.b32.xlu1 %v1016_v26, %s2579_s7  ;;  %v2459_v26 = vld [vmem:[%s2679_s21 + $0x8] sm:$0xff] }
 0x149   : > { %1043 = vrot.lane.b32.xlu0 %v1000_v8, %s2579_s7  ;;  %v880_v61 = vpop.permute.xlu2 %879  ;;  %v1298_v35 = vrot.slane %v2459_v26, 4 }
 0x14a   : > { %v860_v19 = vpop.permute.xlu1 %859  ;;  %v3455_v36 = vsel %vm1189_vm11, %v1178_v52, %v880_v61 }
 0x14b   : > { %v1191_v12 = vsel %vm1189_vm11, %v3350_v30, %v860_v19  ;;  %v790_v3 = vpop.permute.xlu0 %789  ;;  %v1301_v58 = vsel %vm1296_vm13, %v1298_v35, %v1300_v55  ;;  %v2461_v19 = vld [vmem:[%s2679_s21] sm:$0xff] }
 0x14c   : > { %v1188_v7 = vsel %vm1156_vm9, %v3273_v46, %v790_v3  ;;  %v1023_v46 = vor.u32 %v1022_v43, %v1021_v11  ;;  %v1348_v63 = vunpack.c.l.bf16 %v1301_v58  ;;  %v1349_v60 = vunpack.c.h.bf16 %v1301_v58 }
 0x14d   : > { %v1297_v61 = vrot.slane %v2461_v19, 4 }
 0x14e   : > { %v1024_v32 = vsel %vm957_vm10, %v1019_v34, %v1023_v46  ;;  %v2383_v29 = vpack.i.bf16 %v1349_v60, %v1348_v63 }
 0x14f   : > { %1053 = vrot.lane.b32.xlu2 %v1020_v6, %s2579_s7  ;;  %v1299_v6 = vsel %vm1296_vm13, %v1297_v61, %v1298_v35  ;;  %v2468_v35 = vld [vmem:[%s2679_s21 + $0x50] sm:$0xff] }
 0x150   : > { %1047 = vrot.lane.b32.xlu1 %v1008_v59, %s2579_s7  ;;  %v1347_v11 = vunpack.c.h.bf16 %v1299_v6  ;;  %v1316_v1 = vrot.slane %v2468_v35, 4 }
 0x151   : > { %1045 = vrot.lane.b32.xlu0 %v1004_v28, %s2579_s7  ;;  %v886_v56 = vpop.permute.xlu2 %885  ;;  %v1346_v28 = vunpack.c.l.bf16 %v1299_v6 }
 0x152   : > { %v866_v30 = vpop.permute.xlu1 %865  ;;  %v3471_v23 = vsel %vm1189_vm11, %v1184_v44, %v886_v56 }
 0x153   : > { %v1197_v62 = vsel %vm1189_vm11, %v3377_v14, %v866_v30  ;;  %v864_v22 = vpop.permute.xlu0 %863  ;;  %v2377_v56 = vpack.i.bf16 %v1347_v11, %v1346_v28 }
 0x154   : > { %v3475_v5 = vsel %vm1189_vm11, %v3291_v0, %v864_v22 }
 0x157   : > { %2384 = vperm.xlu2 %2382, %v2383_v29  }
 0x158   : > { %2378 = vperm.xlu1 %2376, %v2377_v56   ;;  %v2470_v56 = vld [vmem:[%s2679_s21 + $0x60] sm:$0xff] }
 0x159   : > { %1055 = vrot.lane.b32.xlu0 %v1024_v32, %s2579_s7  ;;  %v926_v51 = vpop.permute.xlu2 %925 }
 0x15a   : > { %v872_v25 = vpop.permute.xlu1 %871  ;;  %v3482_v14 = vsel %vm1222_vm12, %v1191_v12, %v926_v51  ;;  %v2462_v12 = vld [vmem:[%s2679_s21 + $0x20] sm:$0xff]  ;;  %v2464_v51 = vld [vmem:[%s2679_s21 + $0x18] sm:$0xff] }
 0x15b   : > { %v1203_v52 = vsel %vm1189_vm11, %v3400_v41, %v872_v25  ;;  %v870_v17 = vpop.permute.xlu0 %869  ;;  %v1304_v3 = vrot.slane %v2462_v12, 4 }
 0x15c   : > { %v3486_v27 = vsel %vm1189_vm11, %v3309_v4, %v870_v17  ;;  %v2279_v4 = vld [vmem:[%s3982_s2 + $0x10] sm:$0xff] }
 0x15d   : > { %2288 = vmatpush.bf16.msra.mxu3 %v2279_v4  ;;  %1635 = vmatpush.bf16.msra.mxu0 %v2279_v4  ;;  %v2465_v17 = vld [vmem:[%s2679_s21 + $0x30] sm:$0xff] }
 0x15e   : > { %2287 = vmatpush.bf16.msra.mxu2 %v2279_v4  ;;  %2286 = vmatpush.bf16.msra.mxu1 %v2279_v4 }
 0x161   : > { %v932_v57 = vpop.permute.xlu2 %931  ;;  %2291 = vmatpush.bf16.msra.mxu3 %v2278_v18  ;;  %1636 = vmatpush.bf16.msra.mxu0 %v2278_v18 }
 0x162   : > { %v878_v0 = vpop.permute.xlu1 %877  ;;  %v3491_v54 = vsel %vm1222_vm12, %v1197_v62, %v932_v57  ;;  %2290 = vmatpush.bf16.msra.mxu2 %v2278_v18  ;;  %2289 = vmatpush.bf16.msra.mxu1 %v2278_v18  ;;  %v2466_v57 = vld [vmem:[%s2679_s21 + $0x38] sm:$0xff] }
 0x163   : > { %v1209_v13 = vsel %vm1189_vm11, %v3421_v42, %v878_v0  ;;  %v876_v9 = vpop.permute.xlu0 %875  ;;  %v1308_v0 = vrot.slane %v2465_v17, 4 }
 0x164   : > { %v3495_v41 = vsel %vm1189_vm11, %v3327_v16, %v876_v9 }
 0x165   : > { %2294 = vmatpush.bf16.msra.mxu3 %v2277_v37  ;;  %1637 = vmatpush.bf16.msra.mxu0 %v2277_v37 }
 0x166   : > { %2293 = vmatpush.bf16.msra.mxu2 %v2277_v37  ;;  %2292 = vmatpush.bf16.msra.mxu1 %v2277_v37 }
 0x169   : > { %v938_v10 = vpop.permute.xlu2 %937 }
 0x16a   : > { %v3503_v42 = vpop.permute.xlu1 %883  ;;  %v3506_v16 = vsel %vm1222_vm12, %v1203_v52, %v938_v10  ;;  %v1302_v52 = vrot.slane %v2464_v51, 4 }
 0x16b   : > { %v882_v2 = vpop.permute.xlu0 %881 }
 0x16c   : > { %v3510_v45 = vsel %vm1189_vm11, %v3345_v21, %v882_v2  ;;  %v1305_v9 = vsel %vm1296_vm13, %v1302_v52, %v1304_v3  ;;  %v1303_v60 = vsel %vm1296_vm13, %v1300_v55, %v1302_v52 }
 0x16d   : > { %v1352_v20 = vunpack.c.l.bf16 %v1305_v9  ;;  %v1353_v4 = vunpack.c.h.bf16 %v1305_v9  ;;  %v1350_v61 = vunpack.c.l.bf16 %v1303_v60 }
 0x16f   : > { %v2394_v18 = vpack.i.bf16 %v1353_v4, %v1352_v20 }
 0x171   : > { %v944_v33 = vpop.permute.xlu2 %943  ;;  %2395 = vperm.xlu1 %2376, %v2394_v18  }
 0x172   : > { %v890_v31 = vpop.permute.xlu1 %889  ;;  %v3520_v44 = vsel %vm1222_vm12, %v1209_v13, %v944_v33  ;;  %v1310_v13 = vrot.slane %v2466_v57, 4 }
 0x173   : > { %v1221_v21 = vsel %vm1189_vm11, %v1188_v7, %v890_v31  ;;  %v888_v24 = vpop.permute.xlu0 %887  ;;  %v2463_v7 = vld [vmem:[%s2679_s21 + $0x28] sm:$0xff] }
 0x174   : > { %v3529_v48 = vsel %vm1189_vm11, %v3371_v53, %v888_v24  ;;  %v1306_v59 = vrot.slane %v2463_v7, 4  ;;  %v2467_v24 = vld [vmem:[%s2679_s21 + $0x48] sm:$0xff]  ;;  %v1351_v7 = vunpack.c.h.bf16 %v1303_v60 }
 0x175   : > { %v1314_v26 = vrot.slane %v2467_v24, 4 }
 0x176   : > { %v1307_v38 = vsel %vm1296_vm13, %v1304_v3, %v1306_v59  ;;  %v1309_v63 = vsel %vm1296_vm13, %v1306_v59, %v1308_v0  ;;  %v1215_v59 = vsel %vm1189_vm11, %v3440_v40, %v3503_v42  ;;  %v2469_v40 = vld [vmem:[%s2679_s21 + $0x40] sm:$0xff] }
 0x177   : > { %v1354_v43 = vunpack.c.l.bf16 %v1307_v38  ;;  %v1355_v30 = vunpack.c.h.bf16 %v1307_v38  ;;  %v1356_v29 = vunpack.c.l.bf16 %v1309_v63  ;;  %v1317_v19 = vsel %vm1296_vm13, %v1314_v26, %v1316_v1 }
 0x178   : > { %v1364_v12 = vunpack.c.l.bf16 %v1317_v19  ;;  %v1365_v3 = vunpack.c.h.bf16 %v1317_v19  ;;  %v1312_v42 = vrot.slane %v2469_v40, 4 }
 0x179   : > { %v3534_v50 = vpop.permute.xlu2 %949  ;;  %v2399_v46 = vpack.i.bf16 %v1355_v30, %v1354_v43 }
 0x17a   : > { %v930_v8 = vpop.permute.xlu1 %929  ;;  %v2424_v28 = vpack.i.bf16 %v1365_v3, %v1364_v12  ;;  %v1248_v47 = vsel %vm1222_vm12, %v1215_v59, %v3534_v50  ;;  %v2471_v50 = vld [vmem:[%s2679_s21 + $0x68] sm:$0xff]  ;;  %v1313_v51 = vsel %vm1296_vm13, %v1310_v13, %v1312_v42  ;;  %v2473_v12 = vld [vmem:[%s2679_s21 + $0x70] sm:$0xff] }
 0x17b   : > { %v3538_v53 = vsel %vm1222_vm12, %v3475_v5, %v930_v8  ;;  %v3540_v34 = vpop.permute.xlu0 %927  ;;  %2400 = vperm.xlu2 %2382, %v2399_v46   ;;  %v1357_v8 = vunpack.c.h.bf16 %v1309_v63  ;;  %v1320_v46 = vrot.slane %v2470_v56, 4  ;;  %v1361_v20 = vunpack.c.h.bf16 %v1313_v51 }
 0x17c   : > { %v1324_v3 = vrot.slane %v2473_v12, 4 }
 0x17d   : > { %v2404_v6 = vpack.i.bf16 %v1357_v8, %v1356_v29 }
 0x17f   : > { %2405 = vperm.xlu1 %2376, %v2404_v6   ;;  %v2474_v6 = vld [vmem:[%s2679_s21 + $0x78] sm:$0xff] }
 0x181   : > { %v956_v22 = vpop.permute.xlu2 %955 }
 0x182   : > { %v936_v62 = vpop.permute.xlu1 %935  ;;  %v3552_v32 = vsel %vm1222_vm12, %v1221_v21, %v956_v22  ;;  %v1315_v22 = vsel %vm1296_vm13, %v1312_v42, %v1314_v26 }
 0x183   : > { %v3549_v5 = vsel %vm1222_vm12, %v3486_v27, %v936_v62  ;;  %v3554_v25 = vpop.permute.xlu0 %933  ;;  %v1311_v27 = vsel %vm1296_vm13, %v1308_v0, %v1310_v13  ;;  %v1322_v62 = vrot.slane %v2471_v50, 4  ;;  %v1363_v52 = vunpack.c.h.bf16 %v1315_v22  ;;  %v2472_v13 = vld [vmem:[%s2679_s21 + $0x58] sm:$0xff] }
 0x184   : > { %v1358_v10 = vunpack.c.l.bf16 %v1311_v27  ;;  %v1359_v2 = vunpack.c.h.bf16 %v1311_v27  ;;  %v1360_v0 = vunpack.c.l.bf16 %v1313_v51 }
 0x185   : > { %v1323_v17 = vsel %vm1296_vm13, %v1320_v46, %v1322_v62 }
 0x186   : > { %v2409_v37 = vpack.i.bf16 %v1359_v2, %v1358_v10  ;;  %v1370_v57 = vunpack.c.l.bf16 %v1323_v17  ;;  %v1371_v9 = vunpack.c.h.bf16 %v1323_v17  ;;  %v2414_v10 = vpack.i.bf16 %v1361_v20, %v1360_v0 }
 0x188   : > { %2410 = vperm.xlu2 %2382, %v2409_v37   ;;  %v2439_v27 = vpack.i.bf16 %v1371_v9, %v1370_v57  ;;  %v1318_v37 = vrot.slane %v2472_v13, 4 }
 0x189   : > { %v3563_v33 = vpop.permute.xlu2 %1029 }
 0x18a   : > { %v3561_v31 = vpop.permute.xlu1 %941  ;;  %v1321_v35 = vsel %vm1296_vm13, %v1318_v37, %v1320_v46 }
 0x18b   : > { %v940_v21 = vpop.permute.xlu0 %939  ;;  %v1368_v60 = vunpack.c.l.bf16 %v1321_v35  ;;  %v1369_v29 = vunpack.c.h.bf16 %v1321_v35  ;;  %v1240_v40 = vsel %vm1222_vm12, %v3495_v41, %v3561_v31 }
 0x18c   : > { %v3569_v58 = vsel %vm1222_vm12, %v3436_v39, %v940_v21  ;;  %v2389_v39 = vpack.i.bf16 %v1351_v7, %v1350_v61  ;;  %v1319_v21 = vsel %vm1296_vm13, %v1316_v1, %v1318_v37  ;;  %v1325_v1 = vsel %vm1296_vm13, %v1322_v62, %v1324_v3 }
 0x18d   : > { %v1366_v24 = vunpack.c.l.bf16 %v1319_v21  ;;  %v1367_v26 = vunpack.c.h.bf16 %v1319_v21  ;;  %v2434_v19 = vpack.i.bf16 %v1369_v29, %v1368_v60  ;;  %v1373_v59 = vunpack.c.h.bf16 %v1325_v1 }
 0x18e   : > { %2390 = vperm.xlu0 %2388, %v2389_v39   ;;  %v1372_v39 = vunpack.c.l.bf16 %v1325_v1  ;;  %v1226_v62 = vsel %vm1222_vm12, %v3395_v15, %v3540_v34  ;;  %v2475_v34 = vld [vmem:[%s2684_s29] sm:$0xff] }
 0x18f   : > { %v2429_v63 = vpack.i.bf16 %v1367_v26, %v1366_v24 }
 0x190   : > { %2425 = vperm.xlu2 %2382, %v2424_v28   ;;  %v1326_v28 = vrot.slane %v2474_v6, 4 }
 0x191   : > { %v1050_v11 = vpop.permute.xlu2 %1049 }
 0x192   : > { %v948_v55 = vpop.permute.xlu1 %947  ;;  %v1281_v30 = vsel %vm1255_vm15, %v1248_v47, %v1050_v11  ;;  %v1327_v47 = vsel %vm1296_vm13, %v1324_v3, %v1326_v28 }
 0x193   : > { %v3583_v38 = vsel %vm1222_vm12, %v3510_v45, %v948_v55  ;;  %v3585_v43 = vpop.permute.xlu0 %945  ;;  %2242 = vmatmul.msk.bf16.vlgmr.msra.gmra.mxu3 %vm1597_vm14, %v1281_v30  ;;  %v1362_v45 = vunpack.c.l.bf16 %v1315_v22  ;;  %v2444_v55 = vpack.i.bf16 %v1373_v59, %v1372_v39  ;;  %v1374_v11 = vunpack.c.l.bf16 %v1327_v47 }
 0x194   : > { %v1375_v30 = vunpack.c.h.bf16 %v1327_v47  ;;  %v1232_v22 = vsel %vm1222_vm12, %v3417_v49, %v3554_v25  ;;  %v1328_v25 = vrot.slane %v2475_v34, 4  ;;  %v1244_v37 = vsel %vm1222_vm12, %v3455_v36, %v3585_v43 }
 0x195   : > { %v2419_v4 = vpack.i.bf16 %v1363_v52, %v1362_v45 }
 0x196   : > { %2415 = vperm.xlu0 %2388, %v2414_v10   ;;  %v1329_v9 = vsel %vm1296_vm13, %v1326_v28, %v1328_v25 }
 0x197   : > { %2420 = vperm.xlu1 %2376, %v2419_v4   ;;  %v1376_v20 = vunpack.c.l.bf16 %v1329_v9  ;;  %v1377_v4 = vunpack.c.h.bf16 %v1329_v9 }
 0x198   : > { %2440 = vperm.xlu2 %2382, %v2439_v27  }
 0x199   : > { %v1038_v31 = vpop.permute.xlu2 %1037  ;;  %v2454_v27 = vpack.i.bf16 %v1377_v4, %v1376_v20 }
 0x19a   : > { %v3595_v2 = vpop.permute.xlu1 %953  ;;  %v1269_v21 = vsel %vm1255_vm15, %v3506_v16, %v1038_v31 }
 0x19b   : > { %v952_v18 = vpop.permute.xlu0 %951  ;;  %v1252_v13 = vsel %vm1222_vm12, %v3529_v48, %v3595_v2 }
 0x19c   : > { %v1250_v52 = vsel %vm1222_vm12, %v3471_v23, %v952_v18  ;;  %v1261_v23 = vsel %vm1255_vm15, %v3538_v53, %v3563_v33 }
 0x19e   : > { %2430 = vperm.xlu0 %2388, %v2429_v63  }
 0x19f   : > { %2435 = vperm.xlu1 %2376, %v2434_v19  }
 0x1a0   : > { %2455 = vperm.xlu2 %2382, %v2454_v27  }
 0x1a1   : > { %v1040_v57 = vpop.permute.xlu2 %1039 }
 0x1a2   : > { %v1028_v8 = vpop.permute.xlu1 %1027 }
 0x1a3   : > { %v1026_v61 = vpop.permute.xlu0 %1025  ;;  %v1259_v51 = vsel %vm1255_vm15, %v1226_v62, %v1028_v8 }
 0x1a4   : > { %v1257_v7 = vsel %vm1255_vm15, %v3482_v14, %v1026_v61  ;;  %v2449_v14 = vpack.i.bf16 %v1375_v30, %v1374_v11 }
 0x1a5   : > { %2230 = vmatmul.msk.bf16.vlgmr.msra.gmra.mxu0 %vm1597_vm14, %v1257_v7 }
 0x1a6   : > { %2445 = vperm.xlu0 %2388, %v2444_v55  }
 0x1a7   : > { %2450 = vperm.xlu1 %2376, %v2449_v14  }
 0x1aa   : > { %v1042_v42 = vpop.permute.xlu1 %1041 }
 0x1ab   : > { %v1032_v56 = vpop.permute.xlu0 %1031  ;;  %v1273_v46 = vsel %vm1255_vm15, %v1240_v40, %v1042_v42 }
 0x1ac   : > { %2238 = vmatmul.msk.bf16.vlgmr.msra.gmra.mxu2 %vm1597_vm14, %v1273_v46 }
 0x1b2   : > { %v1036_v50 = vpop.permute.xlu1 %1035 }
 0x1b3   : > { %v1034_v41 = vpop.permute.xlu0 %1033  ;;  %v1267_v10 = vsel %vm1255_vm15, %v3549_v5, %v1036_v50  ;;  %v1263_v5 = vsel %vm1255_vm15, %v3491_v54, %v1032_v56  ;;  %v1271_v54 = vsel %vm1255_vm15, %v3569_v58, %v1040_v57 }
 0x1b4   : > { %v1265_v45 = vsel %vm1255_vm15, %v1232_v22, %v1034_v41 }
 0x1b5   : > { %2231 = vmatmul.msk.bf16.gmra.mxu0 %vm1597_vm14, %v1259_v51  ;;  %2234 = vmatmul.msk.bf16.vlgmr.msra.gmra.mxu1 %vm1597_vm14, %v1265_v45 }
 0x1ba   : > { %v1052_v17 = vpop.permute.xlu1 %1051 }
 0x1bb   : > { %v1044_v0 = vpop.permute.xlu0 %1043  ;;  %v1283_v15 = vsel %vm1255_vm15, %v1250_v52, %v1052_v17 }
 0x1bc   : > { %v1275_v49 = vsel %vm1255_vm15, %v3520_v44, %v1044_v0  ;;  %2243 = vmatmul.msk.bf16.gmra.mxu3 %vm1597_vm14, %v1283_v15  ;;  %v1054_v44 = vpop.permute.xlu2 %1053 }
 0x1bd   : > { %2239 = vmatmul.msk.bf16.gmra.mxu2 %vm1597_vm14, %v1275_v49  ;;  %v1285_v53 = vsel %vm1255_vm15, %v1252_v13, %v1054_v44 }
 0x1c2   : > { %v1048_v36 = vpop.permute.xlu1 %1047 }
 0x1c3   : > { %v1046_v18 = vpop.permute.xlu0 %1045  ;;  %v1279_v2 = vsel %vm1255_vm15, %v3583_v38, %v1048_v36 }
 0x1c4   : > { %v1277_v33 = vsel %vm1255_vm15, %v1244_v37, %v1046_v18  ;;  %v2385_v16 = vpop.permute.xlu2 %2384 }
 0x1c5   : > { %2232 = vmatmul.msk.bf16.gmra.mxu0 %vm1597_vm14, %v1261_v23  ;;  %2235 = vmatmul.msk.bf16.gmra.mxu1 %vm1597_vm14, %v1267_v10  ;;  %v2386_v41 = vunpack.i.l.bf16 %v2385_v16  ;;  %v2387_v4 = vunpack.i.h.bf16 %v2385_v16 }
 0x1ca   : > { %v2379_v63 = vpop.permute.xlu1 %2378 }
 0x1cb   : > { %v1056_v48 = vpop.permute.xlu0 %1055  ;;  %v2380_v6 = vunpack.i.l.bf16 %v2379_v63  ;;  %v2381_v42 = vunpack.i.h.bf16 %v2379_v63 }
 0x1cc   : > { %2244 = vmatmul.msk.bf16.gmra.mxu3 %vm1597_vm14, %v1285_v53  ;;  %v1287_v43 = vsel %vm1255_vm15, %v3552_v32, %v1056_v48  ;;  %v1378_v32 = vld [vmem:[%s3982_s2 + $0x20] sm:$0x1] }
 0x1cd   : > { %2240 = vmatmul.msk.bf16.gmra.mxu2 %vm1597_vm14, %v1277_v33  ;;  %v1379_v38 = vunpack.c.l.bf16 %v1378_v32 }
 0x1cf   : > { %v3670_v8 = vperm.slane %v1379_v38, 0 }
 0x1d1   : > { %v1541_v47 = vmul.f32 %v2380_v6, %v3670_v8  ;;  %v1542_v50 = vmul.f32 %v2381_v42, %v3670_v8  ;;  %v1543_v15 = vmul.f32 %v2386_v41, %v3670_v8  ;;  %v1544_v33 = vmul.f32 %v2387_v4, %v3670_v8 }
 0x1d5   : > { %2233 = vmatmul.msk.bf16.gmra.mxu0 %vm1597_vm14, %v1263_v5  ;;  %2236 = vmatmul.msk.bf16.gmra.mxu1 %vm1597_vm14, %v1269_v21  ;;  %v2401_v24 = vpop.permute.xlu2 %2400 }
 0x1d6   : > { %v2402_v31 = vunpack.i.l.bf16 %v2401_v24  ;;  %v2403_v27 = vunpack.i.h.bf16 %v2401_v24 }
 0x1d8   : > { %v1549_v49 = vmul.f32 %v2402_v31, %v3670_v8  ;;  %v1550_v5 = vmul.f32 %v2403_v27, %v3670_v8 }
 0x1dc   : > { %2245 = vmatmul.msk.bf16.gmra.mxu3 %vm1597_vm14, %v1287_v43 }
 0x1dd   : > { %2241 = vmatmul.msk.bf16.gmra.mxu2 %vm1597_vm14, %v1279_v2 }
 0x1e2   : > { %v3663_v26 = vpop.permute.xlu2 %2410 }
 0x1e3   : > { %v3672_v19 = vpop.permute.xlu1 %2395 }
 0x1e5   : > { %2237 = vmatmul.msk.bf16.gmra.mxu1 %vm1597_vm14, %v1271_v54 }
 0x1ea   : > { %v3665_v35 = vpop.permute.xlu2 %2425 }
 0x1eb   : > { %v2427_v36 = vunpack.i.l.bf16 %v3665_v35 }
 0x1f1   : > { %v3679_v28 = vpop.permute.xlu1 %2405 }
 0x1f2   : > { %v2441_v60 = vpop.permute.xlu2 %2440  ;;  %v2407_v16 = vunpack.i.l.bf16 %v3679_v28 }
 0x1f3   : > { %v2442_v29 = vunpack.i.l.bf16 %v2441_v60  ;;  %v2443_v3 = vunpack.i.h.bf16 %v2441_v60 }
 0x1f4   : > { %v1551_v6 = vmul.f32 %v2407_v16, %v3670_v8 }
 0x1f5   : > { %v1565_v58 = vmul.f32 %v2442_v29, %v3670_v8  ;;  %v1566_v39 = vmul.f32 %v2443_v3, %v3670_v8 }
 0x200   : > { %v3675_v12 = vpop.permute.xlu0 %2390 }
 0x201   : > { %v2392_v24 = vunpack.i.l.bf16 %v3675_v12 }
 0x208   : > { %v3683_v11 = vpop.permute.xlu0 %2415 }
 0x209   : > { %v2421_v46 = vpop.permute.xlu1 %2420 }
 0x20a   : > { %v2422_v62 = vunpack.i.l.bf16 %v2421_v46  ;;  %v2423_v34 = vunpack.i.h.bf16 %v2421_v46 }
 0x20c   : > { %v1557_v52 = vmul.f32 %v2422_v62, %v3670_v8  ;;  %v1558_v44 = vmul.f32 %v2423_v34, %v3670_v8 }
 0x210   : > { %v3690_v45 = vpop.permute.xlu0 %2430 }
 0x211   : > { %v3712_v60 = vpop.permute.xlu1 %2435 }
 0x216   : > { %v1699_v61 = vpop.f32.mrf.mxu3 }
 0x217   : > { %v1700_v7 = vadd.f32 %v1699_v61, %v1565_v58  ;;  %v1559_v61 = vmul.f32 %v2427_v36, %v3670_v8 }
 0x218   : > { %v2446_v37 = vpop.permute.xlu0 %2445 }
 0x219   : > { %v3677_v1 = vmul.f32 %v1700_v7, %v1700_v7  ;;  %v2447_v48 = vunpack.i.l.bf16 %v2446_v37  ;;  %v1545_v7 = vmul.f32 %v2392_v24, %v3670_v8 }
 0x21b   : > { %v1567_v38 = vmul.f32 %v2447_v48, %v3670_v8 }
 0x21e   : > { %v1701_v59 = vpop.f32.mrf.mxu3 }
 0x21f   : > { %v1702_v55 = vadd.f32 %v1701_v59, %v1566_v39  ;;  %v2448_v39 = vunpack.i.h.bf16 %v2446_v37 }
 0x221   : > { %v3685_v30 = vmul.f32 %v1702_v55, %v1702_v55  ;;  %v1568_v31 = vmul.f32 %v2448_v39, %v3670_v8  ;;  %v2433_v39 = vunpack.i.h.bf16 %v3690_v45 }
 0x222   : > { %v1639_v40 = vpop.f32.mrf.mxu0 }
 0x223   : > { %v1640_v14 = vadd.f32 %v1639_v40, %v1541_v47  ;;  %v2428_v40 = vunpack.i.h.bf16 %v3665_v35 }
 0x225   : > { %v3687_v56 = vmul.f32 %v1640_v14, %v1640_v14  ;;  %v1560_v35 = vmul.f32 %v2428_v40, %v3670_v8  ;;  %v2413_v40 = vunpack.i.h.bf16 %v3663_v26 }
 0x22a   : > { %v1641_v22 = vpop.f32.mrf.mxu0 }
 0x22b   : > { %v1642_v51 = vadd.f32 %v1641_v22, %v1542_v50  ;;  %v2393_v50 = vunpack.i.h.bf16 %v3675_v12 }
 0x22d   : > { %v3693_v17 = vmul.f32 %v1642_v51, %v1642_v51  ;;  %v2408_v51 = vunpack.i.h.bf16 %v3679_v28  ;;  %v1546_v34 = vmul.f32 %v2393_v50, %v3670_v8 }
 0x22f   : > { %v1679_v0 = vpop.f32.mrf.mxu2  ;;  %v1552_v4 = vmul.f32 %v2408_v51, %v3670_v8 }
 0x230   : > { %v1680_v25 = vadd.f32 %v1679_v0, %v1557_v52 }
 0x232   : > { %v3697_v57 = vmul.f32 %v1680_v25, %v1680_v25  ;;  %v1644_v9 = vpop.f32.mrf.mxu0  ;;  %v1659_v20 = vpop.f32.mrf.mxu1 }
 0x233   : > { %v1645_v23 = vadd.f32 %v1644_v9, %v1543_v15  ;;  %v1660_v10 = vadd.f32 %v1659_v20, %v1549_v49  ;;  %v2451_v15 = vpop.permute.xlu1 %2450  ;;  %v2432_v9 = vunpack.i.l.bf16 %v3690_v45 }
 0x234   : > { %v2452_v27 = vunpack.i.l.bf16 %v2451_v15 }
 0x235   : > { %v3700_v18 = vmul.f32 %v1645_v23, %v1645_v23  ;;  %v3702_v13 = vmul.f32 %v1660_v10, %v1660_v10  ;;  %v1561_v36 = vmul.f32 %v2432_v9, %v3670_v8  ;;  %v2437_v9 = vunpack.i.l.bf16 %v3712_v60 }
 0x237   : > { %v1681_v53 = vpop.f32.mrf.mxu2 }
 0x238   : > { %v1682_v21 = vadd.f32 %v1681_v53, %v1558_v44 }
 0x23a   : > { %v3707_v43 = vmul.f32 %v1682_v21, %v1682_v21  ;;  %v1646_v2 = vpop.f32.mrf.mxu0  ;;  %v1661_v54 = vpop.f32.mrf.mxu1 }
 0x23b   : > { %v1647_v63 = vadd.f32 %v1646_v2, %v1544_v33  ;;  %v1662_v32 = vadd.f32 %v1661_v54, %v1550_v5  ;;  %v2412_v33 = vunpack.i.l.bf16 %v3663_v26  ;;  %v2397_v5 = vunpack.i.l.bf16 %v3672_v19 }
 0x23c   : > { %v1569_v2 = vmul.f32 %v2452_v27, %v3670_v8 }
 0x23d   : > { %v3714_v29 = vmul.f32 %v1647_v63, %v1647_v63  ;;  %v3716_v58 = vmul.f32 %v1662_v32, %v1662_v32  ;;  %v1547_v32 = vmul.f32 %v2397_v5, %v3670_v8 }
 0x23f   : > { %v1704_v3 = vpop.f32.mrf.mxu3 }
 0x240   : > { %v1684_v59 = vpop.f32.mrf.mxu2  ;;  %v1705_v47 = vadd.f32 %v1704_v3, %v1567_v38  ;;  %v1553_v38 = vmul.f32 %v2412_v33, %v3670_v8  ;;  %v1563_v33 = vmul.f32 %v2437_v9, %v3670_v8 }
 0x241   : > { %v1685_v55 = vadd.f32 %v1684_v59, %v1559_v61  ;;  %v2453_v61 = vunpack.i.h.bf16 %v2451_v15 }
 0x242   : > { %v3722_v42 = vmul.f32 %v1705_v47, %v1705_v47  ;;  %v1649_v14 = vpop.f32.mrf.mxu0  ;;  %v1664_v46 = vpop.f32.mrf.mxu1 }
 0x243   : > { %v3725_v62 = vmul.f32 %v1685_v55, %v1685_v55  ;;  %v1650_v22 = vadd.f32 %v1649_v14, %v1545_v7  ;;  %v1665_v41 = vadd.f32 %v1664_v46, %v1551_v6  ;;  %v2398_v14 = vunpack.i.h.bf16 %v3672_v19 }
 0x245   : > { %v3729_v52 = vmul.f32 %v1650_v22, %v1650_v22  ;;  %v3731_v0 = vmul.f32 %v1665_v41, %v1665_v41  ;;  %v1570_v22 = vmul.f32 %v2453_v61, %v3670_v8  ;;  %v2456_v41 = vpop.permute.xlu2 %2455 }
 0x246   : > { %v2457_v26 = vunpack.i.l.bf16 %v2456_v41 }
 0x247   : > { %v1706_v49 = vpop.f32.mrf.mxu3 }
 0x248   : > { %v1686_v25 = vpop.f32.mrf.mxu2  ;;  %v1707_v12 = vadd.f32 %v1706_v49, %v1568_v31  ;;  %v1562_v31 = vmul.f32 %v2433_v39, %v3670_v8  ;;  %v1548_v49 = vmul.f32 %v2398_v14, %v3670_v8 }
 0x249   : > { %v1687_v20 = vadd.f32 %v1686_v25, %v1560_v35 }
 0x24a   : > { %v3737_v23 = vmul.f32 %v1707_v12, %v1707_v12  ;;  %v1651_v28 = vpop.f32.mrf.mxu0  ;;  %v1666_v10 = vpop.f32.mrf.mxu1 }
 0x24b   : > { %v3739_v44 = vmul.f32 %v1687_v20, %v1687_v20  ;;  %v1652_v37 = vadd.f32 %v1651_v28, %v1546_v34  ;;  %v1667_v53 = vadd.f32 %v1666_v10, %v1552_v4  ;;  %v1554_v34 = vmul.f32 %v2413_v40, %v3670_v8 }
 0x24c   : > { %v2417_v28 = vunpack.i.l.bf16 %v3683_v11 }
 0x24d   : > { %v3743_v21 = vmul.f32 %v1652_v37, %v1652_v37  ;;  %v3745_v48 = vmul.f32 %v1667_v53, %v1667_v53  ;;  %v1571_v53 = vmul.f32 %v2457_v26, %v3670_v8 }
 0x24f   : > { %v1709_v54 = vpop.f32.mrf.mxu3 }
 0x250   : > { %v1689_v16 = vpop.f32.mrf.mxu2  ;;  %v1710_v24 = vadd.f32 %v1709_v54, %v1569_v2 }
 0x251   : > { %v1690_v63 = vadd.f32 %v1689_v16, %v1561_v36  ;;  %v1555_v16 = vmul.f32 %v2417_v28, %v3670_v8 }
 0x252   : > { %v3751_v3 = vmul.f32 %v1710_v24, %v1710_v24  ;;  %v1654_v7 = vpop.f32.mrf.mxu0  ;;  %v1669_v6 = vpop.f32.mrf.mxu1  ;;  %v2458_v24 = vunpack.i.h.bf16 %v2456_v41 }
 0x253   : > { %v3754_v59 = vmul.f32 %v1690_v63, %v1690_v63  ;;  %v1655_v47 = vadd.f32 %v1654_v7, %v1547_v32  ;;  %v1670_v55 = vadd.f32 %v1669_v6, %v1553_v38  ;;  %v2438_v38 = vunpack.i.h.bf16 %v3712_v60 }
 0x254   : > { %v2418_v6 = vunpack.i.h.bf16 %v3683_v11 }
 0x255   : > { %v3758_v46 = vmul.f32 %v1655_v47, %v1655_v47  ;;  %v3760_v50 = vmul.f32 %v1670_v55, %v1670_v55  ;;  %v1572_v47 = vmul.f32 %v2458_v24, %v3670_v8  ;;  %v1564_v55 = vmul.f32 %v2438_v38, %v3670_v8 }
 0x257   : > { %v1711_v51 = vpop.f32.mrf.mxu3 }
 0x258   : > { %v1691_v15 = vpop.f32.mrf.mxu2  ;;  %v1712_v45 = vadd.f32 %v1711_v51, %v1570_v22 }
 0x259   : > { %v1692_v35 = vadd.f32 %v1691_v15, %v1562_v31  ;;  %v1556_v31 = vmul.f32 %v2418_v6, %v3670_v8 }
 0x25a   : > { %v3766_v25 = vmul.f32 %v1712_v45, %v1712_v45  ;;  %v1656_v19 = vpop.f32.mrf.mxu0  ;;  %v1671_v12 = vpop.f32.mrf.mxu1 }
 0x25b   : > { %v3769_v20 = vmul.f32 %v1692_v35, %v1692_v35  ;;  %v1657_v4 = vadd.f32 %v1656_v19, %v1548_v49  ;;  %v1672_v27 = vadd.f32 %v1671_v12, %v1554_v34 }
 0x25d   : > { %v3772_v10 = vmul.f32 %v1657_v4, %v1657_v4  ;;  %v3774_v37 = vmul.f32 %v1672_v27, %v1672_v27 }
 0x25f   : > { %v1714_v5 = vpop.f32.mrf.mxu3 }
 0x260   : > { %v1694_v36 = vpop.f32.mrf.mxu2  ;;  %v1715_v2 = vadd.f32 %v1714_v5, %v1571_v53 }
 0x261   : > { %v1695_v54 = vadd.f32 %v1694_v36, %v1563_v33 }
 0x262   : > { %v3779_v63 = vmul.f32 %v1715_v2, %v1715_v2  ;;  %v1674_v32 = vpop.f32.mrf.mxu1 }
 0x263   : > { %v3782_v61 = vmul.f32 %v1695_v54, %v1695_v54  ;;  %v1675_v7 = vadd.f32 %v1674_v32, %v1555_v16 }
 0x265   : > { %v3785_v39 = vmul.f32 %v1675_v7, %v1675_v7 }
 0x267   : > { %v1716_v40 = vpop.f32.mrf.mxu3 }
 0x268   : > { %v1696_v14 = vpop.f32.mrf.mxu2  ;;  %v1717_v22 = vadd.f32 %v1716_v40, %v1572_v47 }
 0x269   : > { %v1697_v41 = vadd.f32 %v1696_v14, %v1564_v55  ;;  %1754 = sbr.rel (%p2246_p2) target bundleno = 687 (0x2af), region = 40 }
 0x26a   : > { %v3790_v51 = vmul.f32 %v1717_v22, %v1717_v22  ;;  %v1676_v60 = vpop.f32.mrf.mxu1 }
 0x26b   : > { %v3792_v15 = vmul.f32 %v1697_v41, %v1697_v41  ;;  %v1677_v45 = vadd.f32 %v1676_v60, %v1556_v31 }
 0x26d   : > { %v3794_v35 = vmul.f32 %v1677_v45, %v1677_v45 }
 0x26e   : > { %v1756_v11 = vadd.f32 %v3693_v17, %v3687_v56  ;;  %v1755_v60 = vld [vmem:[%s2686_s18] sm:$0xff] }
 0x270   : > { %v1757_v49 = vadd.f32 %v1756_v11, %v3700_v18 }
 0x272   : > { %v1758_v34 = vadd.f32 %v1757_v49, %v3714_v29 }
 0x274   : > { %v1759_v8 = vadd.f32 %v1758_v34, %v3729_v52 }
 0x276   : > { %v1760_v26 = vadd.f32 %v1759_v8, %v3743_v21 }
 0x278   : > { %v1761_v19 = vadd.f32 %v1760_v26, %v3758_v46 }
 0x27a   : > { %v1762_v12 = vadd.f32 %v1761_v19, %v3772_v10 }
 0x27c   : > { %v1763_v9 = vadd.f32 %v1762_v12, %v3702_v13 }
 0x27e   : > { %v1764_v4 = vadd.f32 %v1763_v9, %v3716_v58 }
 0x280   : > { %v1765_v27 = vadd.f32 %v1764_v4, %v3731_v0 }
 0x282   : > { %v1766_v28 = vadd.f32 %v1765_v27, %v3745_v48 }
 0x284   : > { %v1767_v53 = vadd.f32 %v1766_v28, %v3760_v50 }
 0x286   : > { %v1768_v33 = vadd.f32 %v1767_v53, %v3774_v37 }
 0x288   : > { %v1769_v5 = vadd.f32 %v1768_v33, %v3785_v39 }
 0x28a   : > { %v1770_v36 = vadd.f32 %v1769_v5, %v3794_v35 }
 0x28c   : > { %v1771_v2 = vadd.f32 %v1770_v36, %v3697_v57 }
 0x28e   : > { %v1772_v54 = vadd.f32 %v1771_v2, %v3707_v43 }
 0x290   : > { %v1773_v16 = vadd.f32 %v1772_v54, %v3725_v62 }
 0x292   : > { %v1774_v24 = vadd.f32 %v1773_v16, %v3739_v44 }
 0x294   : > { %v1775_v32 = vadd.f32 %v1774_v24, %v3754_v59 }
 0x296   : > { %v1776_v38 = vadd.f32 %v1775_v32, %v3769_v20 }
 0x298   : > { %v1777_v7 = vadd.f32 %v1776_v38, %v3782_v61 }
 0x29a   : > { %v1778_v6 = vadd.f32 %v1777_v7, %v3792_v15 }
 0x29c   : > { %v1779_v47 = vadd.f32 %v1778_v6, %v3677_v1 }
 0x29e   : > { %v1780_v55 = vadd.f32 %v1779_v47, %v3685_v30 }
 0x2a0   : > { %v1781_v40 = vadd.f32 %v1780_v55, %v3722_v42 }
 0x2a2   : > { %v1782_v14 = vadd.f32 %v1781_v40, %v3737_v23 }
 0x2a4   : > { %v1783_v22 = vadd.f32 %v1782_v14, %v3751_v3 }
 0x2a6   : > { %v1784_v41 = vadd.f32 %v1783_v22, %v3766_v25 }
 0x2a8   : > { %v1785_v31 = vadd.f32 %v1784_v41, %v3779_v63 }
 0x2aa   : > { %v1786_v45 = vadd.f32 %v1785_v31, %v3790_v51 }
 0x2ac   : > { %v1787_v11 = vadd.f32 %v1786_v45, %v1755_v60 }
 0x2ae   : > { %1788 = vst [vmem:[%s2686_s18] sm:$0xff] %v1787_v11 }
 0x2af PF: > { %p2247_p4 = scmp.ne.s32.totalorder %s2554_s15, 3 }
 0x2b0   : > { %s2248_s23 = sshll.u32 (!%p2247_p4), %s2554_s15, 8 }
 0x2b1   : > { %1792 = sbr.rel (%p2247_p4) target bundleno = 769 (0x301), region = 44 }
 0x2b6   : > { %v1794_v49 = vlaneseq  ;;  %v3836_v26 = vstv %s2248_s23 }
 0x2b8   : > { %v3832_v34 = vshrl.u32 %v1794_v49, 7 }
 0x2ba   : > { %v1796_v8 = vadd.s32 8, %v3832_v34  ;;  %v1797_v19 = vadd.s32 16, %v3832_v34  ;;  %v1798_v12 = vadd.s32 24, %v3832_v34  ;;  %v1828_v9 = vadd.s32 %v3836_v26, %v3832_v34 }
 0x2bb   : > { %v1799_v27 = vadd.s32 32, %v3832_v34  ;;  %v1800_v53 = vadd.s32 40, %v3832_v34  ;;  %v1801_v5 = vadd.s32 48, %v3832_v34  ;;  %v1802_v16 = vadd.s32 56, %v3832_v34 }
 0x2bc   : > { %v1829_v4 = vadd.s32 %v3836_v26, %v1796_v8  ;;  %v1830_v28 = vadd.s32 %v3836_v26, %v1797_v19  ;;  %v1831_v33 = vadd.s32 %v3836_v26, %v1798_v12  ;;  %vm1860_vm0 = vcmp.lt.s32.totalorder %v1828_v9, 1000 }
 0x2bd   : > { %v1832_v36 = vadd.s32 %v3836_v26, %v1799_v27  ;;  %v1956_v2 = vsel %vm1860_vm0, %v3687_v56, 0.0  ;;  %v1833_v24 = vadd.s32 %v3836_v26, %v1800_v53  ;;  %v1803_v38 = vadd.s32 64, %v3832_v34 }
 0x2be   : > { %vm1861_vm1 = vcmp.lt.s32.totalorder %v1829_v4, 1000  ;;  %vm1862_vm2 = vcmp.lt.s32.totalorder %v1830_v28, 1000  ;;  %vm1863_vm3 = vcmp.lt.s32.totalorder %v1831_v33, 1000  ;;  %v1834_v7 = vadd.s32 %v3836_v26, %v1801_v5 }
 0x2bf   : > { %v1957_v54 = vsel %vm1861_vm1, %v3693_v17, 0.0  ;;  %v1958_v32 = vsel %vm1862_vm2, %v3700_v18, 0.0  ;;  %vm1864_vm4 = vcmp.lt.s32.totalorder %v1832_v36, 1000  ;;  %v1959_v47 = vsel %vm1863_vm3, %v3714_v29, 0.0 }
 0x2c0   : > { %v1989_v6 = vadd.f32 %v1957_v54, %v1956_v2  ;;  %v1804_v55 = vadd.s32 72, %v3832_v34  ;;  %v1835_v56 = vadd.s32 %v3836_v26, %v1802_v16  ;;  %vm1865_vm5 = vcmp.lt.s32.totalorder %v1833_v24, 1000 }
 0x2c1   : > { %v1960_v40 = vsel %vm1864_vm4, %v3729_v52, 0.0  ;;  %v1805_v14 = vadd.s32 80, %v3832_v34  ;;  %v1836_v18 = vadd.s32 %v3836_v26, %v1803_v38  ;;  %vm1866_vm6 = vcmp.lt.s32.totalorder %v1834_v7, 1000 }
 0x2c2   : > { %v1990_v17 = vadd.f32 %v1989_v6, %v1958_v32  ;;  %v1961_v41 = vsel %vm1865_vm5, %v3743_v21, 0.0  ;;  %v1806_v31 = vadd.s32 88, %v3832_v34  ;;  %v1837_v29 = vadd.s32 %v3836_v26, %v1804_v55 }
 0x2c3   : > { %vm1867_vm7 = vcmp.lt.s32.totalorder %v1835_v56, 1000  ;;  %v1962_v45 = vsel %vm1866_vm6, %v3758_v46, 0.0  ;;  %v1807_v11 = vadd.s32 96, %v3832_v34  ;;  %v1838_v52 = vadd.s32 %v3836_v26, %v1805_v14 }
 0x2c4   : > { %v1991_v22 = vadd.f32 %v1990_v17, %v1959_v47  ;;  %vm1868_vm8 = vcmp.lt.s32.totalorder %v1836_v18, 1000  ;;  %v1963_v8 = vsel %vm1867_vm7, %v3772_v10, 0.0  ;;  %v1808_v19 = vadd.s32 104, %v3832_v34 }
 0x2c5   : > { %v1839_v21 = vadd.s32 %v3836_v26, %v1806_v31  ;;  %vm1869_vm9 = vcmp.lt.s32.totalorder %v1837_v29, 1000  ;;  %v1964_v9 = vsel %vm1868_vm8, %v3702_v13, 0.0  ;;  %v1809_v4 = vadd.s32 112, %v3832_v34 }
 0x2c6   : > { %v1992_v60 = vadd.f32 %v1991_v22, %v1960_v40  ;;  %v1840_v46 = vadd.s32 %v3836_v26, %v1807_v11  ;;  %vm1870_vm10 = vcmp.lt.s32.totalorder %v1838_v52, 1000  ;;  %v1965_v28 = vsel %vm1869_vm9, %v3716_v58, 0.0 }
 0x2c7   : > { %v1810_v53 = vadd.s32 120, %v3832_v34  ;;  %v1841_v10 = vadd.s32 %v3836_v26, %v1808_v19  ;;  %vm1871_vm11 = vcmp.lt.s32.totalorder %v1839_v21, 1000  ;;  %v1966_v5 = vsel %vm1870_vm10, %v3731_v0, 0.0 }
 0x2c8   : > { %v1993_v49 = vadd.f32 %v1992_v60, %v1961_v41  ;;  %v1811_v36 = vadd.s32 128, %v3832_v34  ;;  %v1842_v13 = vadd.s32 %v3836_v26, %v1809_v4  ;;  %vm1872_vm12 = vcmp.lt.s32.totalorder %v1840_v46, 1000 }
 0x2c9   : > { %v1967_v54 = vsel %vm1871_vm11, %v3745_v48, 0.0  ;;  %v1812_v16 = vadd.s32 136, %v3832_v34  ;;  %v1843_v58 = vadd.s32 %v3836_v26, %v1810_v53  ;;  %vm1873_vm13 = vcmp.lt.s32.totalorder %v1841_v10, 1000 }
 0x2ca   : > { %v1994_v12 = vadd.f32 %v1993_v49, %v1962_v45  ;;  %v1968_v32 = vsel %vm1872_vm12, %v3760_v50, 0.0  ;;  %v1813_v38 = vadd.s32 144, %v3832_v34  ;;  %v1844_v0 = vadd.s32 %v3836_v26, %v1811_v36 }
 0x2cb   : > { %vm1874_vm14 = vcmp.lt.s32.totalorder %v1842_v13, 1000  ;;  %v1969_v6 = vsel %vm1873_vm13, %v3774_v37, 0.0  ;;  %v1814_v47 = vadd.s32 152, %v3832_v34  ;;  %v1845_v48 = vadd.s32 %v3836_v26, %v1812_v16 }
 0x2cc   : > { %v1995_v27 = vadd.f32 %v1994_v12, %v1963_v8  ;;  %vm1875_vm15 = vcmp.lt.s32.totalorder %v1843_v58, 1000  ;;  %v1970_v56 = vsel %vm1874_vm14, %v3785_v39, 0.0  ;;  %v1815_v17 = vadd.s32 160, %v3832_v34 }
 0x2cd   : > { %v1846_v50 = vadd.s32 %v3836_v26, %v1813_v38  ;;  %vm1876_vm0 = vcmp.lt.s32.totalorder %v1844_v0, 1000  ;;  %v1971_v14 = vsel %vm1875_vm15, %v3794_v35, 0.0  ;;  %v1816_v18 = vadd.s32 168, %v3832_v34 }
 0x2ce   : > { %v1996_v33 = vadd.f32 %v1995_v27, %v1964_v9  ;;  %v1847_v37 = vadd.s32 %v3836_v26, %v1814_v47  ;;  %vm1877_vm1 = vcmp.lt.s32.totalorder %v1845_v48, 1000  ;;  %v1972_v41 = vsel %vm1876_vm0, %v3697_v57, 0.0 }
 0x2cf   : > { %v1817_v31 = vadd.s32 176, %v3832_v34  ;;  %v1848_v39 = vadd.s32 %v3836_v26, %v1815_v17  ;;  %vm1878_vm2 = vcmp.lt.s32.totalorder %v1846_v50, 1000  ;;  %v1973_v60 = vsel %vm1877_vm1, %v3707_v43, 0.0 }
 0x2d0   : > { %v1997_v2 = vadd.f32 %v1996_v33, %v1965_v28  ;;  %v1818_v45 = vadd.s32 184, %v3832_v34  ;;  %v1849_v35 = vadd.s32 %v3836_v26, %v1816_v18  ;;  %vm1879_vm3 = vcmp.lt.s32.totalorder %v1847_v37, 1000 }
 0x2d1   : > { %v1974_v52 = vsel %vm1878_vm2, %v3725_v62, 0.0  ;;  %v1819_v49 = vadd.s32 192, %v3832_v34  ;;  %v1850_v57 = vadd.s32 %v3836_v26, %v1817_v31  ;;  %vm1880_vm4 = vcmp.lt.s32.totalorder %v1848_v39, 1000 }
 0x2d2   : > { %v1998_v24 = vadd.f32 %v1997_v2, %v1966_v5  ;;  %v1975_v19 = vsel %vm1879_vm3, %v3739_v44, 0.0  ;;  %v1820_v21 = vadd.s32 200, %v3832_v34  ;;  %v1851_v43 = vadd.s32 %v3836_v26, %v1818_v45 }
 0x2d3   : > { %vm1881_vm5 = vcmp.lt.s32.totalorder %v1849_v35, 1000  ;;  %v1976_v9 = vsel %vm1880_vm4, %v3754_v59, 0.0  ;;  %v1821_v4 = vadd.s32 208, %v3832_v34  ;;  %v1852_v62 = vadd.s32 %v3836_v26, %v1819_v49 }
 0x2d4   : > { %v1999_v7 = vadd.f32 %v1998_v24, %v1967_v54  ;;  %vm1882_vm6 = vcmp.lt.s32.totalorder %v1850_v57, 1000  ;;  %v1977_v27 = vsel %vm1881_vm5, %v3769_v20, 0.0  ;;  %v1822_v28 = vadd.s32 216, %v3832_v34 }
 0x2d5   : > { %v1853_v44 = vadd.s32 %v3836_v26, %v1820_v21  ;;  %vm1883_vm7 = vcmp.lt.s32.totalorder %v1851_v43, 1000  ;;  %v1978_v10 = vsel %vm1882_vm6, %v3782_v61, 0.0  ;;  %v1823_v33 = vadd.s32 224, %v3832_v34 }
 0x2d6   : > { %v2000_v55 = vadd.f32 %v1999_v7, %v1968_v32  ;;  %v1854_v59 = vadd.s32 %v3836_v26, %v1821_v4  ;;  %vm1884_vm8 = vcmp.lt.s32.totalorder %v1852_v62, 1000  ;;  %v1979_v36 = vsel %vm1883_vm7, %v3792_v15, 0.0 }
 0x2d7   : > { %v1824_v13 = vadd.s32 232, %v3832_v34  ;;  %v1855_v20 = vadd.s32 %v3836_v26, %v1822_v28  ;;  %vm1885_vm9 = vcmp.lt.s32.totalorder %v1853_v44, 1000  ;;  %v1980_v54 = vsel %vm1884_vm8, %v3677_v1, 0.0 }
 0x2d8   : > { %v2001_v40 = vadd.f32 %v2000_v55, %v1969_v6  ;;  %v1825_v16 = vadd.s32 240, %v3832_v34  ;;  %v1856_v61 = vadd.s32 %v3836_v26, %v1823_v33  ;;  %vm1886_vm10 = vcmp.lt.s32.totalorder %v1854_v59, 1000 }
 0x2d9   : > { %v1981_v24 = vsel %vm1885_vm9, %v3685_v30, 0.0  ;;  %v1826_v32 = vadd.s32 248, %v3832_v34  ;;  %v1857_v15 = vadd.s32 %v3836_v26, %v1824_v13  ;;  %vm1887_vm11 = vcmp.lt.s32.totalorder %v1855_v20, 1000 }
 0x2da   : > { %v2002_v22 = vadd.f32 %v2001_v40, %v1970_v56  ;;  %v1982_v0 = vsel %vm1886_vm10, %v3722_v42, 0.0  ;;  %v1858_v7 = vadd.s32 %v3836_v26, %v1825_v16  ;;  %vm1888_vm12 = vcmp.lt.s32.totalorder %v1856_v61, 1000 }
 0x2db   : > { %v1983_v6 = vsel %vm1887_vm11, %v3737_v23, 0.0  ;;  %v1859_v47 = vadd.s32 %v3836_v26, %v1826_v32  ;;  %vm1889_vm13 = vcmp.lt.s32.totalorder %v1857_v15, 1000  ;;  %v1984_v34 = vsel %vm1888_vm12, %v3751_v3, 0.0  ;;  %v1988_v23 = vld [vmem:[%s2686_s18] sm:$0xff] }
 0x2dc   : > { %v2003_v29 = vadd.f32 %v2002_v22, %v1971_v14  ;;  %vm1890_vm14 = vcmp.lt.s32.totalorder %v1858_v7, 1000  ;;  %v1985_v55 = vsel %vm1889_vm13, %v3766_v25, 0.0 }
 0x2dd   : > { %vm1891_vm15 = vcmp.lt.s32.totalorder %v1859_v47, 1000  ;;  %v1986_v56 = vsel %vm1890_vm14, %v3779_v63, 0.0 }
 0x2de   : > { %v2004_v11 = vadd.f32 %v2003_v29, %v1972_v41  ;;  %v1987_v50 = vsel %vm1891_vm15, %v3790_v51, 0.0 }
 0x2e0   : > { %v2005_v8 = vadd.f32 %v2004_v11, %v1973_v60 }
 0x2e2   : > { %v2006_v12 = vadd.f32 %v2005_v8, %v1974_v52 }
 0x2e4   : > { %v2007_v46 = vadd.f32 %v2006_v12, %v1975_v19 }
 0x2e6   : > { %v2008_v53 = vadd.f32 %v2007_v46, %v1976_v9 }
 0x2e8   : > { %v2009_v5 = vadd.f32 %v2008_v53, %v1977_v27 }
 0x2ea   : > { %v2010_v2 = vadd.f32 %v2009_v5, %v1978_v10 }
 0x2ec   : > { %v2011_v58 = vadd.f32 %v2010_v2, %v1979_v36 }
 0x2ee   : > { %v2012_v38 = vadd.f32 %v2011_v58, %v1980_v54 }
 0x2f0   : > { %v2013_v1 = vadd.f32 %v2012_v38, %v1981_v24 }
 0x2f2   : > { %v2014_v30 = vadd.f32 %v2013_v1, %v1982_v0 }
 0x2f4   : > { %v2015_v48 = vadd.f32 %v2014_v30, %v1983_v6 }
 0x2f6   : > { %v2016_v42 = vadd.f32 %v2015_v48, %v1984_v34 }
 0x2f8   : > { %v2017_v17 = vadd.f32 %v2016_v42, %v1985_v55 }
 0x2fa   : > { %v2018_v40 = vadd.f32 %v2017_v17, %v1986_v56 }
 0x2fc   : > { %v2019_v14 = vadd.f32 %v2018_v40, %v1987_v50 }
 0x2fe   : > { %v2020_v26 = vadd.f32 %v2019_v14, %v1988_v23 }
 0x300   : > { %2021 = vst [vmem:[%s2686_s18] sm:$0xff] %v2020_v26 }
 0x301 PF: > { %s2250_s15 = sshll.u32 %s2558_s16, 3  ;;  %s2035_s6 = sshll.u32 %s2686_s18, 4  ;;  %s2036_s6 = int_to_ptr.vmem [resolvable:$true] %s2035_s6 }
 0x302   : > { %s2033_s5 = scalar_lea.hbm %s3983_s3, %s2250_s15  ;;  %s4093_s8 = sand.u32 1, %s2546_s13  }
 0x303   : > { %s2037_s7 = sshll.u32 %s2033_s5, 4  ;;  %s2023_s9 = scalar_lea.sflag [#allocation3], %s4093_s8  ;;  %s2038_s7 = int_to_ptr.hbm [resolvable:$true] %s2037_s7 }
 0x304   : > { %s2490_s10 = sshra.s32 %s2038_s7, 4  ;;  %s2496_s16 = scalar_lea.hbm %s3983_s3, 32  ;;  %s2491_s10 = int_to_ptr.hbm [resolvable:$true] %s2490_s10 }
 0x305   : > { %s2492_s11 = scalar_lea.hbm %s2491_s10, 8  ;;  %p2497_p8 = scmp.lt.s32.totalorder %s2491_s10, %s3983_s3 }
 0x306   : > { %p2493_p5 = scmp.ne.s32.totalorder %s2491_s10, %s2492_s11  ;;  %p2498_p10 = scmp.lt.s32.totalorder %s2496_s16, %s2492_s11 }
 0x308   : > { %p2494_p6 = pnand %p2493_p5, %p2650_p3  ;;  %p2499_p11 = por %p2498_p10, %p2497_p8 }
 0x30a   : > { %p2495_p7 = pneg %p2494_p6 }
 0x30c   : > { %p2500_p12 = pnand %p2499_p11, %p2495_p7 }
 0x30e   : > { %2503 = shalt.err (!%p2500_p12)
}
 0x30f   : > { %2296 = dma.vmem_to_hbm [thread:$0]  (%p2650_p3), %s2036_s6, 128, %s2038_s7, %s2023_s9  }
 0x310 PF: > { %p2302_p13 = scmp.ge.s32.totalorder %s2570_s19, 2  ;;  %s2049_s18 = sand.u32 1, %s2542_s12  }
 0x311   : > { %s2050_s29 = scalar_lea.sflag [#allocation3], %s2049_s18 }
 0x312   : > { %p2299_p0 = pnand %p2302_p13, %p2660_p9 }
 0x314   : > { %p2300_p1 = pneg %p2299_p0 }
 0x316   : > { %2537 = dma.done.wait (%p2300_p1), %s2050_s29, 128  }
 0x317   : > { %2539 = vsyncadd (%p2300_p1), %s2050_s29, 4294967168  ;;  %s16_s19 = sadd.s32 1, %s2570_s19   ;;  %s4094_s16 = sld [smem:[#allocation5_spill]] }
 0x318   : > { %p13_p2 = scmp.ge.s32.totalorder %s16_s19, 18   ;;  %s4095_s24 = sld [smem:[#allocation6_spill]] }
 0x319   : > { %s4096_s18 = sld [smem:[#allocation7_spill]]  ;;  %s4097_s12 = smov %s2546_s13 }
 0x31a   : > { %s4098_s13 = smov %s2550_s14  ;;  %s4099_s14 = smov %s2668_s28 }
 0x31b   : > { %s4100_s15 = smov %s2562_s17  ;;  %15 = sbr.rel (!%p13_p2) target bundleno = 5 (0x5), region = 82 }
 0x31e   : > { %s4101_s17 = smov %s4095_s24 }
 0x320   :  { %2056 = vsyncpa [#allocation3], 1 }
 0x321   :  { %2058 = vsyncpa [#allocation3 + $0x1], 1 }

</bundles_post_ra>
